<compile_context>
chip_gen: v7x
topology: tpu7x:2x2x1
jax: 0.10.0
libtpu: 0.0.40
codegen_flags: <defaults>
</compile_context>

<pallas_src>
import jax
import jax.numpy as jnp
from jax.experimental import pallas as pl
from jax.experimental.pallas import tpu as pltpu


def _round_up(x, m):
    return ((x + m - 1) // m) * m


def _mlp_kernel(x_ref, w1_ref, b1_ref, w2_ref, b2_ref, o_ref):
    # x:  (TM, D)   bf16      w1: (D, Hp)   bf16     b1: (1, Hp)  f32
    # w2: (Hp, Op)  bf16      b2: (1, Op)   f32      o:  (TM, Op) f32
    h = jnp.dot(x_ref[...], w1_ref[...], preferred_element_type=jnp.float32)
    h = jnp.maximum(h + b1_ref[...], 0.0)            # bias + ReLU on the VPU (f32)
    h = h.astype(jnp.bfloat16)                        # bf16 into the second MXU pass
    y = jnp.dot(h, w2_ref[...], preferred_element_type=jnp.float32)
    o_ref[...] = (y + b2_ref[...]).astype(o_ref.dtype)


def linear_network_forward(x_nchw, w1, b1, w2, b2):
    """x_nchw: (N, C, H, W) float32; w1: (D, 1000); w2: (1000, 10).
    Returns (N, 10) float32 logits (same semantics as the PyTorch module)."""
    n = x_nchw.shape[0]
    d = x_nchw.shape[1] * x_nchw.shape[2] * x_nchw.shape[3]
    x_flat = x_nchw.reshape(n, d)                     # == torch .view(n, c*h*w)

    hidden = w1.shape[1]
    out_dim = w2.shape[1]

    # Lane-align the ragged dims (1000 -> 1024, 10 -> 128) with zero padding;
    # ReLU(0) rows of w2 are zero so the result is bit-identical on [:, :10].
    hp = _round_up(hidden, 128)
    op = _round_up(out_dim, 128)

    # Batch tiling: 256-tall tiles for big batches (fills v6e/v7x MXU), single
    # sublane-aligned tile for tiny batches.
    tm = min(256, _round_up(n, 8))
    n_pad = _round_up(n, tm)

    w1p = jnp.pad(w1, ((0, 0), (0, hp - hidden))).astype(jnp.bfloat16)
    b1p = jnp.pad(b1, (0, hp - hidden)).reshape(1, hp).astype(jnp.float32)
    w2p = jnp.pad(w2, ((0, hp - hidden), (0, op - out_dim))).astype(jnp.bfloat16)
    b2p = jnp.pad(b2, (0, op - out_dim)).reshape(1, op).astype(jnp.float32)
    xp = jnp.pad(x_flat, ((0, n_pad - n), (0, 0))).astype(jnp.bfloat16)

    grid = (n_pad // tm,)
    cost = pl.CostEstimate(
        flops=2 * n_pad * d * hp + 2 * n_pad * hp * op,
        transcendentals=0,
        bytes_accessed=(2 * (d * hp + hp * op)       # bf16 weights
                        + 2 * n_pad * d              # bf16 activations in
                        + 4 * (hp + op)              # f32 biases
                        + 4 * n_pad * op),           # f32 output
    )

    out = pl.pallas_call(
        _mlp_kernel,
        out_shape=jax.ShapeDtypeStruct((n_pad, op), jnp.float32),
        grid=grid,
        in_specs=[
            pl.BlockSpec((tm, d), lambda i: (i, 0)),    # x tile: streamed per step
            pl.BlockSpec((d, hp), lambda i: (0, 0)),    # w1: resident across grid
            pl.BlockSpec((1, hp), lambda i: (0, 0)),    # b1: resident
            pl.BlockSpec((hp, op), lambda i: (0, 0)),   # w2: resident
            pl.BlockSpec((1, op), lambda i: (0, 0)),    # b2: resident
        ],
        out_specs=pl.BlockSpec((tm, op), lambda i: (i, 0)),
        compiler_params=pltpu.CompilerParams(dimension_semantics=("parallel",)),
        cost_estimate=cost,
    )(xp, w1p, b1p, w2p, b2p)

    return out[:n, :out_dim]


def _init_params(key, in_dim, hidden, out_dim):
    # Deterministic PyTorch-style (Kaiming-uniform-ish) init, kept in f32.
    k1, k2, k3, k4 = jax.random.split(key, 4)
    bound1 = 1.0 / jnp.sqrt(in_dim)
    bound2 = 1.0 / jnp.sqrt(hidden)
    w1 = jax.random.uniform(k1, (in_dim, hidden), jnp.float32, -bound1, bound1)
    b1 = jax.random.uniform(k2, (hidden,), jnp.float32, -bound1, bound1)
    w2 = jax.random.uniform(k3, (hidden, out_dim), jnp.float32, -bound2, bound2)
    b2 = jax.random.uniform(k4, (out_dim,), jnp.float32, -bound2, bound2)
    return w1, b1, w2, b2


if __name__ == "__main__":
    # Small shapes consistent with the module: batch=2, channels=4, spatial=16.
    N, C, H, W = 2, 4, 16, 16
    HIDDEN, OUT = 1000, 10
    IN_DIM = C * H * W

    key = jax.random.PRNGKey(0)
    kx, kp = jax.random.split(key)
    x = jax.random.normal(kx, (N, C, H, W), jnp.float32)
    w1, b1, w2, b2 = _init_params(kp, IN_DIM, HIDDEN, OUT)

    out = linear_network_forward(x, w1, b1, w2, b2)
    out = jax.block_until_ready(out)
    assert out.shape == (N, OUT)

    # Reference 1: exact-match reference using the same bf16 input rounding
    # (MXU multiplies bf16 exactly and accumulates in f32, so this is tight).
    x_flat = x.reshape(N, IN_DIM)
    xb = x_flat.astype(jnp.bfloat16).astype(jnp.float32)
    w1b = w1.astype(jnp.bfloat16).astype(jnp.float32)
    w2b = w2.astype(jnp.bfloat16).astype(jnp.float32)
    h_ref = jnp.maximum(xb @ w1b + b1, 0.0).astype(jnp.bfloat16).astype(jnp.float32)
    ref_bf16 = h_ref @ w2b + b2
    assert jnp.allclose(out, ref_bf16, atol=2e-3, rtol=2e-3)

    # Reference 2: loose check against the full-f32 PyTorch-equivalent math
    # (bf16 weight streaming costs a few 1e-3 of absolute error here).
    ref_f32 = jnp.maximum(x_flat @ w1 + b1, 0.0) @ w2 + b2
    assert jnp.allclose(out, ref_f32, atol=5e-2, rtol=5e-2)

    print("KERNEL_OK")
</pallas_src>

<mosaic_0001>
module attributes {stable_mosaic.version = 11 : i64} {
  func.func @_mlp_kernel(%arg0: i32, %arg1: memref<8x1024xbf16, #tpu.memory_space<vmem>>, %arg2: memref<1024x1024xbf16, #tpu.memory_space<vmem>>, %arg3: memref<1x1024xf32, #tpu.memory_space<vmem>>, %arg4: memref<1024x128xbf16, #tpu.memory_space<vmem>>, %arg5: memref<1x128xf32, #tpu.memory_space<vmem>>, %arg6: memref<8x128xf32, #tpu.memory_space<vmem>>) attributes {dimension_semantics = [#tpu.dimension_semantics<parallel>], iteration_bounds = array<i64: 1>, scalar_prefetch = 0 : i64, scratch_operands = 0 : i64, tpu.core_type = #tpu.core_type<tc>, window_params = [{transform_indices = @transform_0, window_bounds = array<i64: 8, 1024>}, {pipeline_mode = #tpu.pipeline_mode<synchronous>, transform_indices = @transform_1, window_bounds = array<i64: 1024, 1024>}, {pipeline_mode = #tpu.pipeline_mode<synchronous>, transform_indices = @transform_2, window_bounds = array<i64: 1, 1024>}, {pipeline_mode = #tpu.pipeline_mode<synchronous>, transform_indices = @transform_3, window_bounds = array<i64: 1024, 128>}, {pipeline_mode = #tpu.pipeline_mode<synchronous>, transform_indices = @transform_4, window_bounds = array<i64: 1, 128>}, {transform_indices = @transform_5, window_bounds = array<i64: 8, 128>}]} {
    %c0 = arith.constant 0 : index
    %c0_0 = arith.constant 0 : index
    %0 = vector.load %arg1[%c0, %c0_0] : memref<8x1024xbf16, #tpu.memory_space<vmem>>, vector<8x1024xbf16>
    %c0_1 = arith.constant 0 : index
    %c0_2 = arith.constant 0 : index
    %1 = vector.load %arg2[%c0_1, %c0_2] : memref<1024x1024xbf16, #tpu.memory_space<vmem>>, vector<1024x1024xbf16>
    %cst = arith.constant dense<0.000000e+00> : vector<8x1024xf32>
    %2 = tpu.matmul %0, %1, %cst {dimension_numbers = #tpu.dot_dimension_numbers<[1], [0], [0], [1], [0, 0, 1, 1], [], []>} : vector<8x1024xbf16>, vector<1024x1024xbf16>, vector<8x1024xf32> -> vector<8x1024xf32>
    %c0_3 = arith.constant 0 : index
    %c0_4 = arith.constant 0 : index
    %3 = vector.load %arg3[%c0_3, %c0_4] : memref<1x1024xf32, #tpu.memory_space<vmem>>, vector<1x1024xf32>
    %4 = vector.broadcast %3 : vector<1x1024xf32> to vector<8x1024xf32>
    %5 = arith.addf %2, %4 : vector<8x1024xf32>
    %cst_5 = arith.constant 0.000000e+00 : f32
    %6 = vector.broadcast %cst_5 : f32 to vector<8x1024xf32>
    %7 = arith.maximumf %5, %6 : vector<8x1024xf32>
    %8 = arith.truncf %7 : vector<8x1024xf32> to vector<8x1024xbf16>
    %c0_6 = arith.constant 0 : index
    %c0_7 = arith.constant 0 : index
    %9 = vector.load %arg4[%c0_6, %c0_7] : memref<1024x128xbf16, #tpu.memory_space<vmem>>, vector<1024x128xbf16>
    %cst_8 = arith.constant dense<0.000000e+00> : vector<8x128xf32>
    %10 = tpu.matmul %8, %9, %cst_8 {dimension_numbers = #tpu.dot_dimension_numbers<[1], [0], [0], [1], [0, 0, 1, 1], [], []>} : vector<8x1024xbf16>, vector<1024x128xbf16>, vector<8x128xf32> -> vector<8x128xf32>
    %c0_9 = arith.constant 0 : index
    %c0_10 = arith.constant 0 : index
    %11 = vector.load %arg5[%c0_9, %c0_10] : memref<1x128xf32, #tpu.memory_space<vmem>>, vector<1x128xf32>
    %12 = vector.broadcast %11 : vector<1x128xf32> to vector<8x128xf32>
    %13 = arith.addf %10, %12 : vector<8x128xf32>
    %c0_11 = arith.constant 0 : index
    %c0_12 = arith.constant 0 : index
    %14 = vector.load %arg6[%c0_11, %c0_12] : memref<8x128xf32, #tpu.memory_space<vmem>>, vector<8x128xf32>
    tpu.vector_store %arg6[%c0_11, %c0_12], %13 {strides = array<i32>} : memref<8x128xf32, #tpu.memory_space<vmem>>, vector<8x128xf32>,
    return
  }
  func.func @transform_0(%arg0: i32) -> (i32, i32) {
    %c0_i32 = arith.constant 0 : i32
    %c0_i32_0 = arith.constant 0 : i32
    return %arg0, %c0_i32 : i32, i32
  }
  func.func @transform_1(%arg0: i32) -> (i32, i32) {
    %c0_i32 = arith.constant 0 : i32
    %c0_i32_0 = arith.constant 0 : i32
    %c0_i32_1 = arith.constant 0 : i32
    return %c0_i32, %c0_i32_0 : i32, i32
  }
  func.func @transform_2(%arg0: i32) -> (i32, i32) {
    %c0_i32 = arith.constant 0 : i32
    %c0_i32_0 = arith.constant 0 : i32
    %c0_i32_1 = arith.constant 0 : i32
    return %c0_i32, %c0_i32_0 : i32, i32
  }
  func.func @transform_3(%arg0: i32) -> (i32, i32) {
    %c0_i32 = arith.constant 0 : i32
    %c0_i32_0 = arith.constant 0 : i32
    %c0_i32_1 = arith.constant 0 : i32
    return %c0_i32, %c0_i32_0 : i32, i32
  }
  func.func @transform_4(%arg0: i32) -> (i32, i32) {
    %c0_i32 = arith.constant 0 : i32
    %c0_i32_0 = arith.constant 0 : i32
    %c0_i32_1 = arith.constant 0 : i32
    return %c0_i32, %c0_i32_0 : i32, i32
  }
  func.func @transform_5(%arg0: i32) -> (i32, i32) {
    %c0_i32 = arith.constant 0 : i32
    %c0_i32_0 = arith.constant 0 : i32
    return %arg0, %c0_i32 : i32, i32
  }
}

</mosaic_0001>

<bundles_post_ra>
// kernel: tpu_custom_call.1
= control target key start
LH: loop header
LB: loop body
LE: loop exit
PB: predicated region body
PF: predicated region fallthrough
CT: control target
= control target key end

     0   :  { %10 = vsyncpa [#allocation3], 0  ;;  %s5766_s0 = inlined_call_operand.hbm [shape: bf16[8,1024], index: 0, kind: input, shape index: {}]   ;;  %s5767_s1 = inlined_call_operand.hbm [shape: bf16[1024,1024], index: 1, kind: input, shape index: {}]   ;;  %s5768_s2 = inlined_call_operand.hbm [shape: f32[1,1024], index: 2, kind: input, shape index: {}]   ;;  %s5769_s3 = inlined_call_operand.hbm [shape: bf16[1024,128], index: 3, kind: input, shape index: {}]   ;;  %s5770_s4 = inlined_call_operand.hbm [shape: f32[1,128], index: 4, kind: input, shape index: {}]   ;;  %s5771_s5 = inlined_call_operand.hbm [shape: f32[8,128], index: 5, kind: output, shape index: {}]  }
   0x1   :  { %11 = vsyncpa [#allocation6], 0 }
   0x2   :  { %12 = vsyncpa [#allocation9], 0 }
   0x3   :  { %13 = vsyncpa [#allocation4], 0  ;;  %s5550_s18 = smov [#allocation5]   ;;  %s5410_s22 = scalar_lea.hbm %s5767_s1, 65536 }
   0x4   :  { %s29_s19 = sshll.u32 %s5550_s18, 4  ;;  %p5411_p0 = scmp.ne.s32.totalorder %s5767_s1, %s5410_s22  ;;  %s30_s19 = int_to_ptr.vmem [resolvable:$true] %s29_s19 }
   0x5   :  { %p5414_p1 = scmp.lt.u32.totalorder %s5410_s22, %s5767_s1 }
   0x7   :  { %p5416_p2 = pnand %p5414_p1, %p5411_p0 }
   0x9   :  { %5419 = shalt.err (!%p5416_p2)
}
   0xa   :  { %s5420_s27 = scalar_lea.vmem %s30_s19, 65536  ;;  %p5425_p4 = scmp.lt.s32.totalorder %s30_s19, %s30_s19 }
   0xb   :  { %p5421_p3 = scmp.ne.s32.totalorder %s30_s19, %s5420_s27  ;;  %p5426_p5 = scmp.lt.s32.totalorder %s5420_s27, %s5420_s27 }
   0xd   :  { %p5427_p6 = por %p5426_p5, %p5425_p4 }
   0xf   :  { %p5428_p7 = pnand %p5427_p6, %p5421_p3 }
  0x11   :  { %5431 = shalt.err (!%p5428_p7)
}
  0x12   :  { %s5551_s28 = smov 512   ;;  %s5552_s29 = smov 32  }
  0x13   :  { %35 = dma.hbm_to_vmem [thread:$0]  %s5767_s1, 65536, %s30_s19, [#allocation6], %s5551_s28, %s5551_s28, %s5552_s29  }
  0x14   :  { %s5553_s7 = smov [#allocation8]   ;;  %s5432_s11 = scalar_lea.hbm %s5769_s3, 8192 }
  0x15   :  { %s51_s8 = sshll.u32 %s5553_s7, 4  ;;  %p5433_p8 = scmp.ne.s32.totalorder %s5769_s3, %s5432_s11  ;;  %s52_s8 = int_to_ptr.vmem [resolvable:$true] %s51_s8 }
  0x16   :  { %p5436_p9 = scmp.lt.u32.totalorder %s5432_s11, %s5769_s3 }
  0x18   :  { %p5438_p10 = pnand %p5436_p9, %p5433_p8 }
  0x1a   :  { %5441 = shalt.err (!%p5438_p10)
}
  0x1b   :  { %s5442_s16 = scalar_lea.vmem %s52_s8, 8192  ;;  %p5447_p12 = scmp.lt.s32.totalorder %s52_s8, %s52_s8 }
  0x1c   :  { %p5443_p11 = scmp.ne.s32.totalorder %s52_s8, %s5442_s16  ;;  %p5448_p13 = scmp.lt.s32.totalorder %s5442_s16, %s5442_s16 }
  0x1e   :  { %p5449_p0 = por %p5448_p13, %p5447_p12 }
  0x20   :  { %p5450_p1 = pnand %p5449_p0, %p5443_p11 }
  0x22   :  { %5453 = shalt.err (!%p5450_p1)
}
  0x23   :  { %s5554_s1 = smov 64   ;;  %s5555_s17 = smov 4  }
  0x24   :  { %57 = dma.hbm_to_vmem [thread:$0]  %s5769_s3, 8192, %s52_s8, [#allocation9], %s5554_s1, %s5554_s1, %s5555_s17  }
  0x25   :  { %s5556_s20 = smov [#allocation2]   ;;  %s5557_s22 = smov [#allocation7]  }
  0x26   :  { %s20_s21 = sshll.u32 %s5556_s20, 4  ;;  %s42_s23 = sshll.u32 %s5557_s22, 4  ;;  %s21_s21 = int_to_ptr.vmem [resolvable:$true] %s20_s21  ;;  %s43_s23 = int_to_ptr.vmem [resolvable:$true] %s42_s23 }
  0x27   :  { %s5454_s26 = scalar_lea.hbm %s5766_s0, 512 }
  0x28   :  { %p5455_p2 = scmp.ne.s32.totalorder %s5766_s0, %s5454_s26  ;;  %p5458_p3 = scmp.lt.u32.totalorder %s5454_s26, %s5766_s0 }
  0x2a   :  { %p5460_p4 = pnand %p5458_p3, %p5455_p2 }
  0x2c   :  { %5463 = shalt.err (!%p5460_p4)
}
  0x2d   :  { %s5464_s3 = scalar_lea.vmem %s21_s21, 512  ;;  %p5469_p6 = scmp.lt.s32.totalorder %s21_s21, %s21_s21 }
  0x2e   :  { %p5465_p5 = scmp.ne.s32.totalorder %s21_s21, %s5464_s3  ;;  %p5470_p7 = scmp.lt.s32.totalorder %s5464_s3, %s5464_s3 }
  0x30   :  { %p5471_p8 = por %p5470_p7, %p5469_p6 }
  0x32   :  { %p5472_p9 = pnand %p5471_p8, %p5465_p5 }
  0x34   :  { %5475 = shalt.err (!%p5472_p9)
}
  0x35   :  { %23 = dma.hbm_to_vmem [thread:$0]  %s5766_s0, 512, %s21_s21, [#allocation3]  }
  0x36   :  { %s5476_s10 = scalar_lea.hbm %s5768_s2, 128 }
  0x37   :  { %p5477_p10 = scmp.ne.s32.totalorder %s5768_s2, %s5476_s10  ;;  %p5480_p11 = scmp.lt.u32.totalorder %s5476_s10, %s5768_s2 }
  0x39   :  { %p5482_p12 = pnand %p5480_p11, %p5477_p10 }
  0x3b   :  { %5485 = shalt.err (!%p5482_p12)
}
  0x3c   :  { %s5486_s15 = scalar_lea.vmem %s43_s23, 128  ;;  %p5491_p0 = scmp.lt.s32.totalorder %s43_s23, %s43_s23 }
  0x3d   :  { %p5487_p13 = scmp.ne.s32.totalorder %s43_s23, %s5486_s15  ;;  %p5492_p1 = scmp.lt.s32.totalorder %s5486_s15, %s5486_s15 }
  0x3f   :  { %p5493_p2 = por %p5492_p1, %p5491_p0 }
  0x41   :  { %p5494_p3 = pnand %p5493_p2, %p5487_p13 }
  0x43   :  { %5497 = shalt.err (!%p5494_p3)
}
  0x44   :  { %45 = dma.hbm_to_vmem [thread:$0]  %s5768_s2, 128, %s43_s23, [#allocation6]  }
  0x45   :  { %s5558_s1 = smov [#allocation10]   ;;  %s5498_s20 = scalar_lea.hbm %s5770_s4, 16 }
  0x46   :  { %s64_s17 = sshll.u32 %s5558_s1, 4  ;;  %p5499_p4 = scmp.ne.s32.totalorder %s5770_s4, %s5498_s20  ;;  %s65_s17 = int_to_ptr.vmem [resolvable:$true] %s64_s17 }
  0x47   :  { %p5502_p5 = scmp.lt.u32.totalorder %s5498_s20, %s5770_s4 }
  0x49   :  { %p5504_p6 = pnand %p5502_p5, %p5499_p4 }
  0x4b   :  { %5507 = shalt.err (!%p5504_p6)
}
  0x4c   :  { %s5508_s26 = scalar_lea.vmem %s65_s17, 16  ;;  %s5512_s2 = scalar_lea.vmem %s65_s17, 32 }
  0x4d   :  { %p5509_p7 = scmp.ne.s32.totalorder %s65_s17, %s5508_s26  ;;  %p5513_p8 = scmp.lt.s32.totalorder %s65_s17, %s65_s17 }
  0x4e   :  { %p5514_p9 = scmp.lt.s32.totalorder %s5512_s2, %s5508_s26 }
  0x50   :  { %p5515_p10 = por %p5514_p9, %p5513_p8 }
  0x52   :  { %p5516_p11 = pnand %p5515_p10, %p5509_p7 }
  0x54   :  { %5519 = shalt.err (!%p5516_p11)
}
  0x55   :  { %67 = dma.hbm_to_vmem [thread:$0]  %s5770_s4, 16, %s65_s17, [#allocation9]  }
  0x56   :  { %5542 = dma.done.wait [#allocation3], 512  }
  0x57   :  { %5543 = vsyncadd [#allocation3], 4294966784 }
  0x58   :  { %5544 = dma.done.wait [#allocation6], 65664  }
  0x59   :  { %5545 = vsyncadd [#allocation6], 4294901632 }
  0x5a   :  { %5546 = dma.done.wait [#allocation9], 8208  }
  0x5b   :  { %5547 = vsyncadd [#allocation9], 4294959088  ;;  %v88_v0 = vld [vmem:[#allocation5] sm:$0xff]  ;;  %v89_v2 = vld [vmem:[#allocation5 + $0x8] sm:$0xff]  ;;  %s5559_s4 = smov [#allocation11]  }
  0x5c   :  { %v92_v1 = vld [vmem:[#allocation5 + $0x20] sm:$0xff]  ;;  %v93_v4 = vld [vmem:[#allocation5 + $0x28] sm:$0xff]  ;;  %s4588_s28 = sshll.u32 %s5559_s4, 4  ;;  %s4589_s28 = int_to_ptr.vmem [resolvable:$true] %s4588_s28 }
  0x5d   :  { %v4608_v3 = vcombine.high %v88_v0, %v92_v1  ;;  %v4607_v5 = vcombine.low %v88_v0, %v92_v1  ;;  %v96_v6 = vld [vmem:[#allocation5 + $0x40] sm:$0xff]  ;;  %v4610_v8 = vcombine.high %v89_v2, %v93_v4  ;;  %v4609_v9 = vcombine.low %v89_v2, %v93_v4  ;;  %v97_v11 = vld [vmem:[#allocation5 + $0x48] sm:$0xff]  ;;  %s5520_s29 = scalar_lea.vmem %s4589_s28, 128  ;;  %p5525_p13 = scmp.lt.s32.totalorder %s4589_s28, %s4589_s28 }
  0x5e   :  { %v100_v7 = vld [vmem:[#allocation5 + $0x60] sm:$0xff]  ;;  %v101_v12 = vld [vmem:[#allocation5 + $0x68] sm:$0xff]  ;;  %p5521_p12 = scmp.ne.s32.totalorder %s4589_s28, %s5520_s29  ;;  %p5526_p0 = scmp.lt.s32.totalorder %s5520_s29, %s5520_s29 }
  0x5f   :  { %v4616_v10 = vcombine.high %v96_v6, %v100_v7  ;;  %v104_v13 = vld [vmem:[#allocation5 + $0x80] sm:$0xff]  ;;  %3230 = vmatprep.subr.bf16.mxu0 %v4608_v3  ;;  %v4618_v14 = vcombine.high %v97_v11, %v101_v12  ;;  %v105_v16 = vld [vmem:[#allocation5 + $0x88] sm:$0xff]  ;;  %3394 = vmatprep.subr.bf16.mxu1 %v4610_v8  ;;  %v4615_v18 = vcombine.low %v96_v6, %v100_v7 }
  0x60   :  { %v108_v15 = vld [vmem:[#allocation5 + $0xa0] sm:$0xff]  ;;  %v109_v17 = vld [vmem:[#allocation5 + $0xa8] sm:$0xff]  ;;  %3231 = vmatpush1.bf16.msra.mxu0 %v4607_v5  ;;  %3395 = vmatpush1.bf16.msra.mxu1 %v4609_v9  ;;  %v4617_v19 = vcombine.low %v97_v11, %v101_v12  ;;  %p5527_p1 = por %p5526_p0, %p5525_p13 }
  0x61   :  { %3232 = vmatprep.subr.bf16.mxu0 %v4616_v10  ;;  %v4624_v20 = vcombine.high %v104_v13, %v108_v15  ;;  %3396 = vmatprep.subr.bf16.mxu1 %v4618_v14  ;;  %v4626_v21 = vcombine.high %v105_v16, %v109_v17  ;;  %v112_v22 = vld [vmem:[#allocation5 + $0xc0] sm:$0xff]  ;;  %v113_v24 = vld [vmem:[#allocation5 + $0xc8] sm:$0xff]  ;;  %v4623_v26 = vcombine.low %v104_v13, %v108_v15 }
  0x62   :  { %v116_v23 = vld [vmem:[#allocation5 + $0xe0] sm:$0xff]  ;;  %v117_v25 = vld [vmem:[#allocation5 + $0xe8] sm:$0xff]  ;;  %v4625_v27 = vcombine.low %v105_v16, %v109_v17  ;;  %p5528_p2 = pnand %p5527_p1, %p5521_p12 }
  0x63   :  { %v4632_v28 = vcombine.high %v112_v22, %v116_v23  ;;  %v4634_v29 = vcombine.high %v113_v24, %v117_v25  ;;  %v120_v30 = vld [vmem:[#allocation5 + $0x100] sm:$0xff]  ;;  %v121_v32 = vld [vmem:[#allocation5 + $0x108] sm:$0xff]  ;;  %v4631_v34 = vcombine.low %v112_v22, %v116_v23  ;;  %v4633_v35 = vcombine.low %v113_v24, %v117_v25 }
  0x64   :  { %3233 = vmatpush1.bf16.msra.mxu0 %v4615_v18  ;;  %3397 = vmatpush1.bf16.msra.mxu1 %v4617_v19  ;;  %v124_v31 = vld [vmem:[#allocation5 + $0x120] sm:$0xff]  ;;  %v125_v33 = vld [vmem:[#allocation5 + $0x128] sm:$0xff] }
  0x65   :  { %3234 = vmatprep.subr.bf16.mxu0 %v4624_v20  ;;  %3398 = vmatprep.subr.bf16.mxu1 %v4626_v21  ;;  %v4640_v36 = vcombine.high %v120_v30, %v124_v31  ;;  %v4642_v37 = vcombine.high %v121_v32, %v125_v33  ;;  %v128_v38 = vld [vmem:[#allocation5 + $0x140] sm:$0xff]  ;;  %v129_v40 = vld [vmem:[#allocation5 + $0x148] sm:$0xff]  ;;  %v4639_v42 = vcombine.low %v120_v30, %v124_v31 }
  0x66   :  { %v132_v39 = vld [vmem:[#allocation5 + $0x160] sm:$0xff]  ;;  %v133_v41 = vld [vmem:[#allocation5 + $0x168] sm:$0xff]  ;;  %v4641_v43 = vcombine.low %v121_v32, %v125_v33 }
  0x67   :  { %v4648_v44 = vcombine.high %v128_v38, %v132_v39  ;;  %v4650_v45 = vcombine.high %v129_v40, %v133_v41  ;;  %v136_v46 = vld [vmem:[#allocation5 + $0x180] sm:$0xff]  ;;  %v137_v48 = vld [vmem:[#allocation5 + $0x188] sm:$0xff]  ;;  %v4647_v50 = vcombine.low %v128_v38, %v132_v39  ;;  %v4649_v51 = vcombine.low %v129_v40, %v133_v41 }
  0x68   :  { %3235 = vmatpush1.bf16.msra.mxu0 %v4623_v26  ;;  %3399 = vmatpush1.bf16.msra.mxu1 %v4625_v27  ;;  %v140_v47 = vld [vmem:[#allocation5 + $0x1a0] sm:$0xff]  ;;  %v141_v49 = vld [vmem:[#allocation5 + $0x1a8] sm:$0xff] }
  0x69   :  { %3236 = vmatprep.subr.bf16.mxu0 %v4632_v28  ;;  %3400 = vmatprep.subr.bf16.mxu1 %v4634_v29  ;;  %v4656_v52 = vcombine.high %v136_v46, %v140_v47  ;;  %v5650_v53 = vld [vmem:[#allocation2] sm:$0xff]  ;;  %v4658_v54 = vcombine.high %v137_v48, %v141_v49  ;;  %v145_v58 = vld [vmem:[#allocation5 + $0x1c8] sm:$0xff]  ;;  %v4655_v60 = vcombine.low %v136_v46, %v140_v47 }
  0x6a   :  { %v144_v55 = vld [vmem:[#allocation5 + $0x1c0] sm:$0xff]  ;;  %v5654_v57 = vcombine.high %v5650_v53, %v5650_v53  ;;  %v149_v59 = vld [vmem:[#allocation5 + $0x1e8] sm:$0xff]  ;;  %v4657_v61 = vcombine.low %v137_v48, %v141_v49 }
  0x6b   :  { %v148_v56 = vld [vmem:[#allocation5 + $0x1e0] sm:$0xff]  ;;  %v4666_v63 = vcombine.high %v145_v58, %v149_v59  ;;  %v153_v2 = vld [vmem:[#allocation5 + $0x208] sm:$0xff]  ;;  %v4665_v5 = vcombine.low %v145_v58, %v149_v59 }
  0x6c   :  { %3237 = vmatpush1.bf16.msra.mxu0 %v4631_v34  ;;  %3401 = vmatpush1.bf16.msra.mxu1 %v4633_v35  ;;  %v4664_v62 = vcombine.high %v144_v55, %v148_v56  ;;  %v152_v0 = vld [vmem:[#allocation5 + $0x200] sm:$0xff]  ;;  %v157_v3 = vld [vmem:[#allocation5 + $0x228] sm:$0xff]  ;;  %v4663_v4 = vcombine.low %v144_v55, %v148_v56 }
  0x6d   :  { %3238 = vmatprep.subr.bf16.mxu0 %v4640_v36  ;;  %3402 = vmatprep.subr.bf16.mxu1 %v4642_v37  ;;  %v156_v1 = vld [vmem:[#allocation5 + $0x220] sm:$0xff]  ;;  %v4674_v7 = vcombine.high %v153_v2, %v157_v3  ;;  %v161_v10 = vld [vmem:[#allocation5 + $0x248] sm:$0xff]  ;;  %v4673_v13 = vcombine.low %v153_v2, %v157_v3 }
  0x6e   :  { %3262 = vmatprep.mubr.bf16.mxu0 %v5654_v57  ;;  %3426 = vmatprep.mubr.bf16.mxu1 %v5654_v57  ;;  %v4672_v6 = vcombine.high %v152_v0, %v156_v1  ;;  %v160_v8 = vld [vmem:[#allocation5 + $0x240] sm:$0xff]  ;;  %v165_v11 = vld [vmem:[#allocation5 + $0x268] sm:$0xff]  ;;  %v4671_v12 = vcombine.low %v152_v0, %v156_v1 }
  0x6f   :  { %v164_v9 = vld [vmem:[#allocation5 + $0x260] sm:$0xff]  ;;  %v4682_v15 = vcombine.high %v161_v10, %v165_v11  ;;  %v169_v18 = vld [vmem:[#allocation5 + $0x288] sm:$0xff]  ;;  %v4681_v21 = vcombine.low %v161_v10, %v165_v11 }
  0x70   :  { %3239 = vmatpush1.bf16.msra.mxu0 %v4639_v42  ;;  %3403 = vmatpush1.bf16.msra.mxu1 %v4641_v43  ;;  %v4680_v14 = vcombine.high %v160_v8, %v164_v9  ;;  %v168_v16 = vld [vmem:[#allocation5 + $0x280] sm:$0xff]  ;;  %v173_v19 = vld [vmem:[#allocation5 + $0x2a8] sm:$0xff]  ;;  %v4679_v20 = vcombine.low %v160_v8, %v164_v9 }
  0x71   :  { %3240 = vmatprep.subr.bf16.mxu0 %v4648_v44  ;;  %3404 = vmatprep.subr.bf16.mxu1 %v4650_v45  ;;  %v172_v17 = vld [vmem:[#allocation5 + $0x2a0] sm:$0xff]  ;;  %v4690_v23 = vcombine.high %v169_v18, %v173_v19  ;;  %v177_v26 = vld [vmem:[#allocation5 + $0x2c8] sm:$0xff]  ;;  %v4689_v29 = vcombine.low %v169_v18, %v173_v19 }
  0x72   :  { %v4688_v22 = vcombine.high %v168_v16, %v172_v17  ;;  %v176_v24 = vld [vmem:[#allocation5 + $0x2c0] sm:$0xff]  ;;  %v181_v27 = vld [vmem:[#allocation5 + $0x2e8] sm:$0xff]  ;;  %v4687_v28 = vcombine.low %v168_v16, %v172_v17 }
  0x73   :  { %v180_v25 = vld [vmem:[#allocation5 + $0x2e0] sm:$0xff]  ;;  %v4698_v31 = vcombine.high %v177_v26, %v181_v27  ;;  %v185_v34 = vld [vmem:[#allocation5 + $0x308] sm:$0xff]  ;;  %v4697_v37 = vcombine.low %v177_v26, %v181_v27 }
  0x74   :  { %3241 = vmatpush1.bf16.msra.mxu0 %v4647_v50  ;;  %3405 = vmatpush1.bf16.msra.mxu1 %v4649_v51  ;;  %v4696_v30 = vcombine.high %v176_v24, %v180_v25  ;;  %v184_v32 = vld [vmem:[#allocation5 + $0x300] sm:$0xff]  ;;  %v189_v35 = vld [vmem:[#allocation5 + $0x328] sm:$0xff]  ;;  %v4695_v36 = vcombine.low %v176_v24, %v180_v25 }
  0x75   :  { %3242 = vmatprep.subr.bf16.mxu0 %v4656_v52  ;;  %3406 = vmatprep.subr.bf16.mxu1 %v4658_v54  ;;  %v188_v33 = vld [vmem:[#allocation5 + $0x320] sm:$0xff]  ;;  %v4706_v39 = vcombine.high %v185_v34, %v189_v35  ;;  %v193_v42 = vld [vmem:[#allocation5 + $0x348] sm:$0xff]  ;;  %v4705_v45 = vcombine.low %v185_v34, %v189_v35 }
  0x76   :  { %v4704_v38 = vcombine.high %v184_v32, %v188_v33  ;;  %v192_v40 = vld [vmem:[#allocation5 + $0x340] sm:$0xff]  ;;  %v197_v43 = vld [vmem:[#allocation5 + $0x368] sm:$0xff]  ;;  %v4703_v44 = vcombine.low %v184_v32, %v188_v33 }
  0x77   :  { %v196_v41 = vld [vmem:[#allocation5 + $0x360] sm:$0xff]  ;;  %v4714_v47 = vcombine.high %v193_v42, %v197_v43  ;;  %v201_v50 = vld [vmem:[#allocation5 + $0x388] sm:$0xff]  ;;  %v4713_v54 = vcombine.low %v193_v42, %v197_v43 }
  0x78   :  { %3243 = vmatpush1.bf16.msra.mxu0 %v4655_v60  ;;  %3407 = vmatpush1.bf16.msra.mxu1 %v4657_v61  ;;  %v4712_v46 = vcombine.high %v192_v40, %v196_v41  ;;  %v200_v48 = vld [vmem:[#allocation5 + $0x380] sm:$0xff]  ;;  %v205_v51 = vld [vmem:[#allocation5 + $0x3a8] sm:$0xff]  ;;  %v4711_v52 = vcombine.low %v192_v40, %v196_v41 }
  0x79   :  { %3244 = vmatprep.subr.bf16.mxu0 %v4664_v62  ;;  %3408 = vmatprep.subr.bf16.mxu1 %v4666_v63  ;;  %v204_v49 = vld [vmem:[#allocation5 + $0x3a0] sm:$0xff]  ;;  %v4722_v56 = vcombine.high %v201_v50, %v205_v51  ;;  %v209_v60 = vld [vmem:[#allocation5 + $0x3c8] sm:$0xff]  ;;  %v4721_v63 = vcombine.low %v201_v50, %v205_v51 }
  0x7a   :  { %v4720_v55 = vcombine.high %v200_v48, %v204_v49  ;;  %v208_v58 = vld [vmem:[#allocation5 + $0x3c0] sm:$0xff]  ;;  %v213_v61 = vld [vmem:[#allocation5 + $0x3e8] sm:$0xff]  ;;  %v4719_v62 = vcombine.low %v200_v48, %v204_v49 }
  0x7b   :  { %v212_v59 = vld [vmem:[#allocation5 + $0x3e0] sm:$0xff]  ;;  %v4730_v1 = vcombine.high %v209_v60, %v213_v61 }
  0x7c   :  { %3245 = vmatpush1.bf16.msra.mxu0 %v4663_v4  ;;  %3409 = vmatpush1.bf16.msra.mxu1 %v4665_v5  ;;  %v4728_v0 = vcombine.high %v208_v58, %v212_v59  ;;  %v216_v2 = vld [vmem:[#allocation5 + $0x400] sm:$0xff]  ;;  %v217_v4 = vld [vmem:[#allocation5 + $0x408] sm:$0xff] }
  0x7d   :  { %3246 = vmatprep.subr.bf16.mxu0 %v4672_v6  ;;  %3410 = vmatprep.subr.bf16.mxu1 %v4674_v7  ;;  %v220_v3 = vld [vmem:[#allocation5 + $0x420] sm:$0xff]  ;;  %v221_v5 = vld [vmem:[#allocation5 + $0x428] sm:$0xff]  ;;  %v4727_v6 = vcombine.low %v208_v58, %v212_v59  ;;  %v4729_v7 = vcombine.low %v209_v60, %v213_v61 }
  0x7e   :  { %v4736_v8 = vcombine.high %v216_v2, %v220_v3  ;;  %v4738_v9 = vcombine.high %v217_v4, %v221_v5  ;;  %v224_v10 = vld [vmem:[#allocation5 + $0x440] sm:$0xff]  ;;  %v4735_v16 = vcombine.low %v216_v2, %v220_v3  ;;  %v4737_v17 = vcombine.low %v217_v4, %v221_v5 }
  0x7f   :  { %v228_v11 = vld [vmem:[#allocation5 + $0x460] sm:$0xff] }
  0x80   :  { %3247 = vmatpush1.bf16.msra.mxu0 %v4671_v12  ;;  %3411 = vmatpush1.bf16.msra.mxu1 %v4673_v13  ;;  %v5660_v12 = vcombine.low %v5650_v53, %v5650_v53  ;;  %v225_v13 = vld [vmem:[#allocation5 + $0x448] sm:$0xff]  ;;  %v4744_v18 = vcombine.high %v224_v10, %v228_v11  ;;  %v232_v19 = vld [vmem:[#allocation5 + $0x480] sm:$0xff]  ;;  %v4743_v24 = vcombine.low %v224_v10, %v228_v11 }
  0x81   :  { %3248 = vmatprep.subr.bf16.mxu0 %v4680_v14  ;;  %3412 = vmatprep.subr.bf16.mxu1 %v4682_v15  ;;  %v229_v14 = vld [vmem:[#allocation5 + $0x468] sm:$0xff]  ;;  %v240_v27 = vld [vmem:[#allocation5 + $0x4c0] sm:$0xff] }
  0x82   :  { %v5662_v15 = vld [vmem:[#allocation2 + $0x8] sm:$0xff]  ;;  %v4745_v25 = vcombine.low %v225_v13, %v229_v14  ;;  %v248_v35 = vld [vmem:[#allocation5 + $0x500] sm:$0xff] }
  0x83   :  { %v5666_v53 = vcombine.high %v5662_v15, %v5662_v15  ;;  %v256_v43 = vld [vmem:[#allocation5 + $0x540] sm:$0xff] }
  0x84   :  { %3249 = vmatpush1.bf16.msra.mxu0 %v4679_v20  ;;  %3413 = vmatpush1.bf16.msra.mxu1 %v4681_v21  ;;  %v236_v20 = vld [vmem:[#allocation5 + $0x4a0] sm:$0xff]  ;;  %v4746_v21 = vcombine.high %v225_v13, %v229_v14 }
  0x85   :  { %3250 = vmatprep.subr.bf16.mxu0 %v4688_v22  ;;  %3414 = vmatprep.subr.bf16.mxu1 %v4690_v23  ;;  %v233_v22 = vld [vmem:[#allocation5 + $0x488] sm:$0xff]  ;;  %v4752_v26 = vcombine.high %v232_v19, %v236_v20  ;;  %v4751_v32 = vcombine.low %v232_v19, %v236_v20  ;;  %v264_v51 = vld [vmem:[#allocation5 + $0x580] sm:$0xff] }
  0x86   :  { %v237_v23 = vld [vmem:[#allocation5 + $0x4a8] sm:$0xff]  ;;  %v272_v61 = vld [vmem:[#allocation5 + $0x5c0] sm:$0xff] }
  0x87   :  { %v4753_v33 = vcombine.low %v233_v22, %v237_v23  ;;  %v280_v5 = vld [vmem:[#allocation5 + $0x600] sm:$0xff]  ;;  %v293_v19 = vld [vmem:[#allocation5 + $0x668] sm:$0xff] }
  0x88   :  { %3251 = vmatpush1.bf16.msra.mxu0 %v4687_v28  ;;  %3415 = vmatpush1.bf16.msra.mxu1 %v4689_v29  ;;  %v244_v28 = vld [vmem:[#allocation5 + $0x4e0] sm:$0xff]  ;;  %v241_v29 = vld [vmem:[#allocation5 + $0x4c8] sm:$0xff] }
  0x89   :  { %3252 = vmatprep.subr.bf16.mxu0 %v4696_v30  ;;  %3416 = vmatprep.subr.bf16.mxu1 %v4698_v31  ;;  %v4754_v30 = vcombine.high %v233_v22, %v237_v23  ;;  %v245_v31 = vld [vmem:[#allocation5 + $0x4e8] sm:$0xff]  ;;  %v4760_v34 = vcombine.high %v240_v27, %v244_v28  ;;  %v4759_v40 = vcombine.low %v240_v27, %v244_v28  ;;  %v288_v14 = vld [vmem:[#allocation5 + $0x640] sm:$0xff] }
  0x8a   :  { %v4761_v41 = vcombine.low %v241_v29, %v245_v31  ;;  %v296_v23 = vld [vmem:[#allocation5 + $0x680] sm:$0xff]  ;;  %v301_v27 = vld [vmem:[#allocation5 + $0x6a8] sm:$0xff] }
  0x8c   :  { %3253 = vmatpush1.bf16.msra.mxu0 %v4695_v36  ;;  %3417 = vmatpush1.bf16.msra.mxu1 %v4697_v37  ;;  %v252_v36 = vld [vmem:[#allocation5 + $0x520] sm:$0xff]  ;;  %v249_v37 = vld [vmem:[#allocation5 + $0x508] sm:$0xff] }
  0x8d   :  { %3254 = vmatprep.subr.bf16.mxu0 %v4704_v38  ;;  %3418 = vmatprep.subr.bf16.mxu1 %v4706_v39  ;;  %v4762_v38 = vcombine.high %v241_v29, %v245_v31  ;;  %v253_v39 = vld [vmem:[#allocation5 + $0x528] sm:$0xff]  ;;  %v4768_v42 = vcombine.high %v248_v35, %v252_v36  ;;  %v4767_v48 = vcombine.low %v248_v35, %v252_v36  ;;  %v304_v31 = vld [vmem:[#allocation5 + $0x6c0] sm:$0xff] }
  0x8e   :  { %v4769_v49 = vcombine.low %v249_v37, %v253_v39  ;;  %v309_v35 = vld [vmem:[#allocation5 + $0x6e8] sm:$0xff] }
  0x90   :  { %3255 = vmatpush1.bf16.msra.mxu0 %v4703_v44  ;;  %3419 = vmatpush1.bf16.msra.mxu1 %v4705_v45  ;;  %v260_v44 = vld [vmem:[#allocation5 + $0x560] sm:$0xff]  ;;  %v257_v45 = vld [vmem:[#allocation5 + $0x548] sm:$0xff] }
  0x91   :  { %3256 = vmatprep.subr.bf16.mxu0 %v4712_v46  ;;  %3420 = vmatprep.subr.bf16.mxu1 %v4714_v47  ;;  %v4770_v46 = vcombine.high %v249_v37, %v253_v39  ;;  %v261_v47 = vld [vmem:[#allocation5 + $0x568] sm:$0xff]  ;;  %v4776_v50 = vcombine.high %v256_v43, %v260_v44  ;;  %v4775_v58 = vcombine.low %v256_v43, %v260_v44  ;;  %v312_v39 = vld [vmem:[#allocation5 + $0x700] sm:$0xff] }
  0x92   :  { %v4777_v59 = vcombine.low %v257_v45, %v261_v47  ;;  %v317_v43 = vld [vmem:[#allocation5 + $0x728] sm:$0xff] }
  0x94   :  { %3257 = vmatpush1.bf16.msra.mxu0 %v4711_v52  ;;  %3421 = vmatpush1.bf16.msra.mxu1 %v4713_v54  ;;  %v268_v52 = vld [vmem:[#allocation5 + $0x5a0] sm:$0xff]  ;;  %v265_v54 = vld [vmem:[#allocation5 + $0x588] sm:$0xff] }
  0x95   :  { %3258 = vmatprep.subr.bf16.mxu0 %v4720_v55  ;;  %3422 = vmatprep.subr.bf16.mxu1 %v4722_v56  ;;  %v4778_v55 = vcombine.high %v257_v45, %v261_v47  ;;  %v269_v56 = vld [vmem:[#allocation5 + $0x5a8] sm:$0xff]  ;;  %v4784_v60 = vcombine.high %v264_v51, %v268_v52  ;;  %v4783_v2 = vcombine.low %v264_v51, %v268_v52  ;;  %v320_v47 = vld [vmem:[#allocation5 + $0x740] sm:$0xff] }
  0x96   :  { %v4785_v3 = vcombine.low %v265_v54, %v269_v56  ;;  %v325_v51 = vld [vmem:[#allocation5 + $0x768] sm:$0xff] }
  0x98   :  { %3259 = vmatpush1.bf16.msra.mxu0 %v4719_v62  ;;  %3423 = vmatpush1.bf16.msra.mxu1 %v4721_v63  ;;  %v276_v62 = vld [vmem:[#allocation5 + $0x5e0] sm:$0xff]  ;;  %v273_v63 = vld [vmem:[#allocation5 + $0x5c8] sm:$0xff] }
  0x99   :  { %3260 = vmatprep.subr.bf16.mxu0 %v4728_v0  ;;  %3424 = vmatprep.subr.bf16.mxu1 %v4730_v1  ;;  %v4786_v0 = vcombine.high %v265_v54, %v269_v56  ;;  %v277_v1 = vld [vmem:[#allocation5 + $0x5e8] sm:$0xff]  ;;  %v4792_v4 = vcombine.high %v272_v61, %v276_v62  ;;  %v4791_v10 = vcombine.low %v272_v61, %v276_v62  ;;  %v328_v56 = vld [vmem:[#allocation5 + $0x780] sm:$0xff] }
  0x9a   :  { %v4793_v11 = vcombine.low %v273_v63, %v277_v1  ;;  %v333_v61 = vld [vmem:[#allocation5 + $0x7a8] sm:$0xff] }
  0x9c   :  { %3261 = vmatpush1.bf16.msra.mxu0 %v4727_v6  ;;  %3425 = vmatpush1.bf16.msra.mxu1 %v4729_v7  ;;  %v284_v6 = vld [vmem:[#allocation5 + $0x620] sm:$0xff]  ;;  %v281_v7 = vld [vmem:[#allocation5 + $0x608] sm:$0xff] }
  0x9d   :  { %3271 = vmatprep.subr.bf16.mxu0 %v4736_v8  ;;  %3435 = vmatprep.subr.bf16.mxu1 %v4738_v9  ;;  %v4794_v8 = vcombine.high %v273_v63, %v277_v1  ;;  %v285_v9 = vld [vmem:[#allocation5 + $0x628] sm:$0xff]  ;;  %v4800_v13 = vcombine.high %v280_v5, %v284_v6  ;;  %v4799_v20 = vcombine.low %v280_v5, %v284_v6  ;;  %v336_v1 = vld [vmem:[#allocation5 + $0x7c0] sm:$0xff] }
  0x9e   :  { %v341_v5 = vld [vmem:[#allocation5 + $0x7e8] sm:$0xff] }
  0x9f   :  { %3263 = vmatmul.mubr.bf16.vlgmr.msra.gmra.mrb[0].mxu0 %v5660_v12  ;;  %3427 = vmatmul.mubr.bf16.vlgmr.msra.gmra.mrb[0].mxu1 %v5660_v12 }
  0xa0   :  { %3272 = vmatpush1.bf16.msra.mxu0 %v4735_v16  ;;  %3436 = vmatpush1.bf16.msra.mxu1 %v4737_v17  ;;  %v292_v16 = vld [vmem:[#allocation5 + $0x660] sm:$0xff]  ;;  %v289_v17 = vld [vmem:[#allocation5 + $0x648] sm:$0xff] }
  0xa1   :  { %3273 = vmatprep.subr.bf16.mxu0 %v4744_v18  ;;  %3437 = vmatprep.subr.bf16.mxu1 %v4746_v21  ;;  %v4802_v18 = vcombine.high %v281_v7, %v285_v9  ;;  %v4801_v21 = vcombine.low %v281_v7, %v285_v9  ;;  %v4808_v22 = vcombine.high %v288_v14, %v292_v16  ;;  %v344_v9 = vld [vmem:[#allocation5 + $0x800] sm:$0xff] }
  0xa2   :  { %3303 = vmatprep.mubr.bf16.mxu0 %v5666_v53  ;;  %3467 = vmatprep.mubr.bf16.mxu1 %v5666_v53  ;;  %v4807_v28 = vcombine.low %v288_v14, %v292_v16  ;;  %v4809_v29 = vcombine.low %v289_v17, %v293_v19  ;;  %v349_v14 = vld [vmem:[#allocation5 + $0x828] sm:$0xff] }
  0xa4   :  { %3274 = vmatpush1.bf16.msra.mxu0 %v4743_v24  ;;  %3438 = vmatpush1.bf16.msra.mxu1 %v4745_v25  ;;  %v300_v24 = vld [vmem:[#allocation5 + $0x6a0] sm:$0xff]  ;;  %v297_v25 = vld [vmem:[#allocation5 + $0x688] sm:$0xff] }
  0xa5   :  { %3275 = vmatprep.subr.bf16.mxu0 %v4752_v26  ;;  %3439 = vmatprep.subr.bf16.mxu1 %v4754_v30  ;;  %v4810_v26 = vcombine.high %v289_v17, %v293_v19  ;;  %v4816_v30 = vcombine.high %v296_v23, %v300_v24  ;;  %v4815_v36 = vcombine.low %v296_v23, %v300_v24  ;;  %v352_v17 = vld [vmem:[#allocation5 + $0x840] sm:$0xff]  ;;  %v5672_v24 = vld [vmem:[#allocation2 + $0x10] sm:$0xff] }
  0xa6   :  { %v4817_v37 = vcombine.low %v297_v25, %v301_v27 }
  0xa8   :  { %3276 = vmatpush1.bf16.msra.mxu0 %v4751_v32  ;;  %3440 = vmatpush1.bf16.msra.mxu1 %v4753_v33  ;;  %v308_v32 = vld [vmem:[#allocation5 + $0x6e0] sm:$0xff]  ;;  %v305_v33 = vld [vmem:[#allocation5 + $0x6c8] sm:$0xff] }
  0xa9   :  { %3277 = vmatprep.subr.bf16.mxu0 %v4760_v34  ;;  %3441 = vmatprep.subr.bf16.mxu1 %v4762_v38  ;;  %v4818_v34 = vcombine.high %v297_v25, %v301_v27  ;;  %v4824_v38 = vcombine.high %v304_v31, %v308_v32  ;;  %v4823_v44 = vcombine.low %v304_v31, %v308_v32  ;;  %v364_v31 = vld [vmem:[#allocation5 + $0x8a0] sm:$0xff] }
  0xaa   :  { %v4825_v45 = vcombine.low %v305_v33, %v309_v35  ;;  %v5676_v25 = vcombine.low %v5662_v15, %v5662_v15  ;;  %v5680_v32 = vcombine.high %v5672_v24, %v5672_v24 }
  0xac   :  { %3278 = vmatpush1.bf16.msra.mxu0 %v4759_v40  ;;  %3442 = vmatpush1.bf16.msra.mxu1 %v4761_v41  ;;  %v316_v40 = vld [vmem:[#allocation5 + $0x720] sm:$0xff]  ;;  %v313_v41 = vld [vmem:[#allocation5 + $0x708] sm:$0xff] }
  0xad   :  { %3279 = vmatprep.subr.bf16.mxu0 %v4768_v42  ;;  %3443 = vmatprep.subr.bf16.mxu1 %v4770_v46  ;;  %v4826_v42 = vcombine.high %v305_v33, %v309_v35  ;;  %v4832_v46 = vcombine.high %v312_v39, %v316_v40  ;;  %v4831_v52 = vcombine.low %v312_v39, %v316_v40  ;;  %v361_v33 = vld [vmem:[#allocation5 + $0x888] sm:$0xff]  ;;  %v372_v39 = vld [vmem:[#allocation5 + $0x8e0] sm:$0xff] }
  0xae   :  { %v4833_v54 = vcombine.low %v313_v41, %v317_v43  ;;  %v369_v40 = vld [vmem:[#allocation5 + $0x8c8] sm:$0xff] }
  0xb0   :  { %3280 = vmatpush1.bf16.msra.mxu0 %v4767_v48  ;;  %3444 = vmatpush1.bf16.msra.mxu1 %v4769_v49  ;;  %v324_v48 = vld [vmem:[#allocation5 + $0x760] sm:$0xff]  ;;  %v321_v49 = vld [vmem:[#allocation5 + $0x748] sm:$0xff] }
  0xb1   :  { %3281 = vmatprep.subr.bf16.mxu0 %v4776_v50  ;;  %3445 = vmatprep.subr.bf16.mxu1 %v4778_v55  ;;  %v4834_v50 = vcombine.high %v313_v41, %v317_v43  ;;  %v4840_v55 = vcombine.high %v320_v47, %v324_v48  ;;  %v4839_v62 = vcombine.low %v320_v47, %v324_v48  ;;  %v373_v41 = vld [vmem:[#allocation5 + $0x8e8] sm:$0xff]  ;;  %v380_v47 = vld [vmem:[#allocation5 + $0x920] sm:$0xff] }
  0xb2   :  { %v4841_v63 = vcombine.low %v321_v49, %v325_v51  ;;  %v377_v48 = vld [vmem:[#allocation5 + $0x908] sm:$0xff] }
  0xb4   :  { %3282 = vmatpush1.bf16.msra.mxu0 %v4775_v58  ;;  %3446 = vmatpush1.bf16.msra.mxu1 %v4777_v59  ;;  %v332_v58 = vld [vmem:[#allocation5 + $0x7a0] sm:$0xff]  ;;  %v329_v59 = vld [vmem:[#allocation5 + $0x788] sm:$0xff] }
  0xb5   :  { %3283 = vmatprep.subr.bf16.mxu0 %v4784_v60  ;;  %3447 = vmatprep.subr.bf16.mxu1 %v4786_v0  ;;  %v4842_v60 = vcombine.high %v321_v49, %v325_v51  ;;  %v4848_v0 = vcombine.high %v328_v56, %v332_v58  ;;  %v4847_v6 = vcombine.low %v328_v56, %v332_v58  ;;  %v381_v49 = vld [vmem:[#allocation5 + $0x928] sm:$0xff]  ;;  %v388_v56 = vld [vmem:[#allocation5 + $0x960] sm:$0xff] }
  0xb6   :  { %v4849_v7 = vcombine.low %v329_v59, %v333_v61  ;;  %v4889_v51 = vcombine.low %v369_v40, %v373_v41  ;;  %v385_v58 = vld [vmem:[#allocation5 + $0x948] sm:$0xff] }
  0xb8   :  { %3284 = vmatpush1.bf16.msra.mxu0 %v4783_v2  ;;  %3448 = vmatpush1.bf16.msra.mxu1 %v4785_v3  ;;  %v340_v2 = vld [vmem:[#allocation5 + $0x7e0] sm:$0xff]  ;;  %v337_v3 = vld [vmem:[#allocation5 + $0x7c8] sm:$0xff] }
  0xb9   :  { %3285 = vmatprep.subr.bf16.mxu0 %v4792_v4  ;;  %3449 = vmatprep.subr.bf16.mxu1 %v4794_v8  ;;  %v4850_v4 = vcombine.high %v329_v59, %v333_v61  ;;  %v4856_v8 = vcombine.high %v336_v1, %v340_v2  ;;  %v4855_v16 = vcombine.low %v336_v1, %v340_v2  ;;  %v389_v59 = vld [vmem:[#allocation5 + $0x968] sm:$0xff]  ;;  %v396_v1 = vld [vmem:[#allocation5 + $0x9a0] sm:$0xff] }
  0xba   :  { %v4897_v61 = vcombine.low %v377_v48, %v381_v49  ;;  %v393_v2 = vld [vmem:[#allocation5 + $0x988] sm:$0xff] }
  0xbc   :  { %3286 = vmatpush1.bf16.msra.mxu0 %v4791_v10  ;;  %3450 = vmatpush1.bf16.msra.mxu1 %v4793_v11  ;;  %v348_v10 = vld [vmem:[#allocation5 + $0x820] sm:$0xff]  ;;  %v345_v11 = vld [vmem:[#allocation5 + $0x808] sm:$0xff] }
  0xbd   :  { %3287 = vmatprep.subr.bf16.mxu0 %v4800_v13  ;;  %3451 = vmatprep.subr.bf16.mxu1 %v4802_v18  ;;  %v4858_v13 = vcombine.high %v337_v3, %v341_v5  ;;  %v4857_v18 = vcombine.low %v337_v3, %v341_v5  ;;  %v4864_v19 = vcombine.high %v344_v9, %v348_v10  ;;  %v397_v3 = vld [vmem:[#allocation5 + $0x9a8] sm:$0xff] }
  0xbe   :  { %v4866_v23 = vcombine.high %v345_v11, %v349_v14  ;;  %v4865_v27 = vcombine.low %v345_v11, %v349_v14  ;;  %v4905_v5 = vcombine.low %v385_v58, %v389_v59  ;;  %v405_v11 = vld [vmem:[#allocation5 + $0x9e8] sm:$0xff]  ;;  %v4913_v14 = vcombine.low %v393_v2, %v397_v3 }
  0xc0   :  { %3288 = vmatpush1.bf16.msra.mxu0 %v4799_v20  ;;  %3452 = vmatpush1.bf16.msra.mxu1 %v4801_v21  ;;  %v356_v20 = vld [vmem:[#allocation5 + $0x860] sm:$0xff]  ;;  %v353_v21 = vld [vmem:[#allocation5 + $0x848] sm:$0xff] }
  0xc1   :  { %3289 = vmatprep.subr.bf16.mxu0 %v4808_v22  ;;  %3453 = vmatprep.subr.bf16.mxu1 %v4810_v26  ;;  %v357_v22 = vld [vmem:[#allocation5 + $0x868] sm:$0xff]  ;;  %v4863_v26 = vcombine.low %v344_v9, %v348_v10  ;;  %v4871_v15 = vcombine.low %v352_v17, %v356_v20  ;;  %v404_v9 = vld [vmem:[#allocation5 + $0x9e0] sm:$0xff] }
  0xc2   :  { %v4873_v35 = vcombine.low %v353_v21, %v357_v22  ;;  %v401_v10 = vld [vmem:[#allocation5 + $0x9c8] sm:$0xff] }
  0xc4   :  { %3290 = vmatpush1.bf16.msra.mxu0 %v4807_v28  ;;  %3454 = vmatpush1.bf16.msra.mxu1 %v4809_v29  ;;  %v4872_v28 = vcombine.high %v352_v17, %v356_v20  ;;  %v4874_v29 = vcombine.high %v353_v21, %v357_v22  ;;  %v4922_v17 = vcombine.high %v401_v10, %v405_v11  ;;  %v409_v20 = vld [vmem:[#allocation5 + $0xa08] sm:$0xff] }
  0xc5   :  { %3291 = vmatprep.subr.bf16.mxu0 %v4816_v30  ;;  %3455 = vmatprep.subr.bf16.mxu1 %v4818_v34  ;;  %v360_v30 = vld [vmem:[#allocation5 + $0x880] sm:$0xff]  ;;  %v365_v34 = vld [vmem:[#allocation5 + $0x8a8] sm:$0xff] }
  0xc6   :  { %v4881_v43 = vcombine.low %v361_v33, %v365_v34  ;;  %v413_v21 = vld [vmem:[#allocation5 + $0xa28] sm:$0xff] }
  0xc8   :  { %3292 = vmatpush1.bf16.msra.mxu0 %v4815_v36  ;;  %3456 = vmatpush1.bf16.msra.mxu1 %v4817_v37  ;;  %v4880_v36 = vcombine.high %v360_v30, %v364_v31  ;;  %v4882_v37 = vcombine.high %v361_v33, %v365_v34  ;;  %v4929_v34 = vcombine.low %v409_v20, %v413_v21 }
  0xc9   :  { %3293 = vmatprep.subr.bf16.mxu0 %v4824_v38  ;;  %3457 = vmatprep.subr.bf16.mxu1 %v4826_v42  ;;  %v368_v38 = vld [vmem:[#allocation5 + $0x8c0] sm:$0xff]  ;;  %v4879_v42 = vcombine.low %v360_v30, %v364_v31  ;;  %v417_v30 = vld [vmem:[#allocation5 + $0xa48] sm:$0xff] }
  0xca   :  { %v421_v31 = vld [vmem:[#allocation5 + $0xa68] sm:$0xff] }
  0xcc   :  { %3294 = vmatpush1.bf16.msra.mxu0 %v4823_v44  ;;  %3458 = vmatpush1.bf16.msra.mxu1 %v4825_v45  ;;  %v4888_v44 = vcombine.high %v368_v38, %v372_v39  ;;  %v4890_v45 = vcombine.high %v369_v40, %v373_v41  ;;  %v4937_v41 = vcombine.low %v417_v30, %v421_v31 }
  0xcd   :  { %3295 = vmatprep.subr.bf16.mxu0 %v4832_v46  ;;  %3459 = vmatprep.subr.bf16.mxu1 %v4834_v50  ;;  %v376_v46 = vld [vmem:[#allocation5 + $0x900] sm:$0xff]  ;;  %v4887_v50 = vcombine.low %v368_v38, %v372_v39  ;;  %v425_v38 = vld [vmem:[#allocation5 + $0xa88] sm:$0xff] }
  0xce   :  { %v429_v39 = vld [vmem:[#allocation5 + $0xaa8] sm:$0xff] }
  0xd0   :  { %3296 = vmatpush1.bf16.msra.mxu0 %v4831_v52  ;;  %3460 = vmatpush1.bf16.msra.mxu1 %v4833_v54  ;;  %v4896_v52 = vcombine.high %v376_v46, %v380_v47  ;;  %v4898_v54 = vcombine.high %v377_v48, %v381_v49  ;;  %v4945_v49 = vcombine.low %v425_v38, %v429_v39 }
  0xd1   :  { %3297 = vmatprep.subr.bf16.mxu0 %v4840_v55  ;;  %3461 = vmatprep.subr.bf16.mxu1 %v4842_v60  ;;  %v384_v55 = vld [vmem:[#allocation5 + $0x940] sm:$0xff]  ;;  %v4895_v60 = vcombine.low %v376_v46, %v380_v47  ;;  %v433_v46 = vld [vmem:[#allocation5 + $0xac8] sm:$0xff] }
  0xd2   :  { %v437_v47 = vld [vmem:[#allocation5 + $0xae8] sm:$0xff] }
  0xd4   :  { %3298 = vmatpush1.bf16.msra.mxu0 %v4839_v62  ;;  %3462 = vmatpush1.bf16.msra.mxu1 %v4841_v63  ;;  %v4904_v62 = vcombine.high %v384_v55, %v388_v56  ;;  %v4906_v63 = vcombine.high %v385_v58, %v389_v59  ;;  %v4953_v59 = vcombine.low %v433_v46, %v437_v47 }
  0xd5   :  { %3299 = vmatprep.subr.bf16.mxu0 %v4848_v0  ;;  %3463 = vmatprep.subr.bf16.mxu1 %v4850_v4  ;;  %v392_v0 = vld [vmem:[#allocation5 + $0x980] sm:$0xff]  ;;  %v4903_v4 = vcombine.low %v384_v55, %v388_v56  ;;  %v441_v55 = vld [vmem:[#allocation5 + $0xb08] sm:$0xff] }
  0xd6   :  { %v445_v56 = vld [vmem:[#allocation5 + $0xb28] sm:$0xff] }
  0xd8   :  { %3300 = vmatpush1.bf16.msra.mxu0 %v4847_v6  ;;  %3464 = vmatpush1.bf16.msra.mxu1 %v4849_v7  ;;  %v4912_v6 = vcombine.high %v392_v0, %v396_v1  ;;  %v4914_v7 = vcombine.high %v393_v2, %v397_v3  ;;  %v4961_v3 = vcombine.low %v441_v55, %v445_v56 }
  0xd9   :  { %3301 = vmatprep.subr.bf16.mxu0 %v4856_v8  ;;  %3465 = vmatprep.subr.bf16.mxu1 %v4858_v13  ;;  %v400_v8 = vld [vmem:[#allocation5 + $0x9c0] sm:$0xff]  ;;  %v4911_v13 = vcombine.low %v392_v0, %v396_v1  ;;  %v449_v0 = vld [vmem:[#allocation5 + $0xb48] sm:$0xff] }
  0xda   :  { %v4919_v22 = vcombine.low %v400_v8, %v404_v9  ;;  %v453_v1 = vld [vmem:[#allocation5 + $0xb68] sm:$0xff] }
  0xdc   :  { %3302 = vmatpush1.bf16.msra.mxu0 %v4855_v16  ;;  %3466 = vmatpush1.bf16.msra.mxu1 %v4857_v18  ;;  %v4920_v16 = vcombine.high %v400_v8, %v404_v9  ;;  %v408_v18 = vld [vmem:[#allocation5 + $0xa00] sm:$0xff]  ;;  %v457_v8 = vld [vmem:[#allocation5 + $0xb88] sm:$0xff] }
  0xdd   :  { %3312 = vmatprep.subr.bf16.mxu0 %v4864_v19  ;;  %3476 = vmatprep.subr.bf16.mxu1 %v4866_v23  ;;  %v412_v19 = vld [vmem:[#allocation5 + $0xa20] sm:$0xff]  ;;  %v4921_v23 = vcombine.low %v401_v10, %v405_v11  ;;  %v461_v9 = vld [vmem:[#allocation5 + $0xba8] sm:$0xff]  ;;  %v4969_v11 = vcombine.low %v449_v0, %v453_v1 }
  0xde   :  { %v4927_v33 = vcombine.low %v408_v18, %v412_v19 }
  0xdf   :  { %3304 = vmatmul.mubr.bf16.vlgmr.msra.gmra.mrb[0].mxu0 %v5676_v25  ;;  %3468 = vmatmul.mubr.bf16.vlgmr.msra.gmra.mrb[0].mxu1 %v5676_v25 }
  0xe0   :  { %3313 = vmatpush1.bf16.msra.mxu0 %v4863_v26  ;;  %3477 = vmatpush1.bf16.msra.mxu1 %v4865_v27  ;;  %v4928_v26 = vcombine.high %v408_v18, %v412_v19  ;;  %v4930_v27 = vcombine.high %v409_v20, %v413_v21  ;;  %v465_v18 = vld [vmem:[#allocation5 + $0xbc8] sm:$0xff]  ;;  %v4977_v21 = vcombine.low %v457_v8, %v461_v9 }
  0xe1   :  { %3314 = vmatprep.subr.bf16.mxu0 %v4872_v28  ;;  %3478 = vmatprep.subr.bf16.mxu1 %v4874_v29  ;;  %v416_v28 = vld [vmem:[#allocation5 + $0xa40] sm:$0xff]  ;;  %v469_v19 = vld [vmem:[#allocation5 + $0xbe8] sm:$0xff] }
  0xe2   :  { %3344 = vmatprep.mubr.bf16.mxu0 %v5680_v32  ;;  %3508 = vmatprep.mubr.bf16.mxu1 %v5680_v32  ;;  %v420_v29 = vld [vmem:[#allocation5 + $0xa60] sm:$0xff] }
  0xe3   :  { %v4935_v40 = vcombine.low %v416_v28, %v420_v29 }
  0xe4   :  { %3315 = vmatpush1.bf16.msra.mxu0 %v4871_v15  ;;  %3479 = vmatpush1.bf16.msra.mxu1 %v4873_v35  ;;  %v4936_v15 = vcombine.high %v416_v28, %v420_v29  ;;  %v4938_v35 = vcombine.high %v417_v30, %v421_v31  ;;  %v473_v28 = vld [vmem:[#allocation5 + $0xc08] sm:$0xff]  ;;  %v4985_v31 = vcombine.low %v465_v18, %v469_v19 }
  0xe5   :  { %3316 = vmatprep.subr.bf16.mxu0 %v4880_v36  ;;  %3480 = vmatprep.subr.bf16.mxu1 %v4882_v37  ;;  %v424_v36 = vld [vmem:[#allocation5 + $0xa80] sm:$0xff]  ;;  %v477_v29 = vld [vmem:[#allocation5 + $0xc28] sm:$0xff] }
  0xe6   :  { %v428_v37 = vld [vmem:[#allocation5 + $0xaa0] sm:$0xff] }
  0xe7   :  { %v4943_v48 = vcombine.low %v424_v36, %v428_v37 }
  0xe8   :  { %3317 = vmatpush1.bf16.msra.mxu0 %v4879_v42  ;;  %3481 = vmatpush1.bf16.msra.mxu1 %v4881_v43  ;;  %v4944_v42 = vcombine.high %v424_v36, %v428_v37  ;;  %v4946_v43 = vcombine.high %v425_v38, %v429_v39  ;;  %v5688_v36 = vcombine.low %v5672_v24, %v5672_v24  ;;  %v481_v37 = vld [vmem:[#allocation5 + $0xc48] sm:$0xff]  ;;  %v5690_v39 = vld [vmem:[#allocation2 + $0x18] sm:$0xff] }
  0xe9   :  { %3318 = vmatprep.subr.bf16.mxu0 %v4888_v44  ;;  %3482 = vmatprep.subr.bf16.mxu1 %v4890_v45  ;;  %v432_v44 = vld [vmem:[#allocation5 + $0xac0] sm:$0xff]  ;;  %v485_v38 = vld [vmem:[#allocation5 + $0xc68] sm:$0xff] }
  0xea   :  { %v436_v45 = vld [vmem:[#allocation5 + $0xae0] sm:$0xff]  ;;  %v489_v24 = vld [vmem:[#allocation5 + $0xc88] sm:$0xff] }
  0xeb   :  { %v4951_v58 = vcombine.low %v432_v44, %v436_v45 }
  0xec   :  { %3319 = vmatpush1.bf16.msra.mxu0 %v4887_v50  ;;  %3483 = vmatpush1.bf16.msra.mxu1 %v4889_v51  ;;  %v4952_v50 = vcombine.high %v432_v44, %v436_v45  ;;  %v4954_v51 = vcombine.high %v433_v46, %v437_v47  ;;  %v488_v44 = vld [vmem:[#allocation5 + $0xc80] sm:$0xff]  ;;  %v5694_v46 = vcombine.high %v5690_v39, %v5690_v39  ;;  %v493_v47 = vld [vmem:[#allocation5 + $0xca8] sm:$0xff] }
  0xed   :  { %3320 = vmatprep.subr.bf16.mxu0 %v4896_v52  ;;  %3484 = vmatprep.subr.bf16.mxu1 %v4898_v54  ;;  %v440_v52 = vld [vmem:[#allocation5 + $0xb00] sm:$0xff] }
  0xee   :  { %v444_v54 = vld [vmem:[#allocation5 + $0xb20] sm:$0xff] }
  0xef   :  { %v4959_v2 = vcombine.low %v440_v52, %v444_v54  ;;  %v492_v45 = vld [vmem:[#allocation5 + $0xca0] sm:$0xff] }
  0xf0   :  { %3321 = vmatpush1.bf16.msra.mxu0 %v4895_v60  ;;  %3485 = vmatpush1.bf16.msra.mxu1 %v4897_v61  ;;  %v4960_v60 = vcombine.high %v440_v52, %v444_v54  ;;  %v4962_v61 = vcombine.high %v441_v55, %v445_v56  ;;  %v496_v52 = vld [vmem:[#allocation5 + $0xcc0] sm:$0xff]  ;;  %v497_v55 = vld [vmem:[#allocation5 + $0xcc8] sm:$0xff] }
  0xf1   :  { %3322 = vmatprep.subr.bf16.mxu0 %v4904_v62  ;;  %3486 = vmatprep.subr.bf16.mxu1 %v4906_v63  ;;  %v448_v62 = vld [vmem:[#allocation5 + $0xb40] sm:$0xff]  ;;  %v501_v56 = vld [vmem:[#allocation5 + $0xce8] sm:$0xff] }
  0xf2   :  { %v452_v63 = vld [vmem:[#allocation5 + $0xb60] sm:$0xff] }
  0xf3   :  { %v4967_v10 = vcombine.low %v448_v62, %v452_v63  ;;  %v500_v54 = vld [vmem:[#allocation5 + $0xce0] sm:$0xff] }
  0xf4   :  { %3323 = vmatpush1.bf16.msra.mxu0 %v4903_v4  ;;  %3487 = vmatpush1.bf16.msra.mxu1 %v4905_v5  ;;  %v4968_v4 = vcombine.high %v448_v62, %v452_v63  ;;  %v4970_v5 = vcombine.high %v449_v0, %v453_v1  ;;  %v504_v62 = vld [vmem:[#allocation5 + $0xd00] sm:$0xff]  ;;  %v505_v0 = vld [vmem:[#allocation5 + $0xd08] sm:$0xff] }
  0xf5   :  { %3324 = vmatprep.subr.bf16.mxu0 %v4912_v6  ;;  %3488 = vmatprep.subr.bf16.mxu1 %v4914_v7  ;;  %v456_v6 = vld [vmem:[#allocation5 + $0xb80] sm:$0xff]  ;;  %v509_v1 = vld [vmem:[#allocation5 + $0xd28] sm:$0xff] }
  0xf6   :  { %v460_v7 = vld [vmem:[#allocation5 + $0xba0] sm:$0xff] }
  0xf7   :  { %v4975_v20 = vcombine.low %v456_v6, %v460_v7  ;;  %v508_v63 = vld [vmem:[#allocation5 + $0xd20] sm:$0xff] }
  0xf8   :  { %3325 = vmatpush1.bf16.msra.mxu0 %v4911_v13  ;;  %3489 = vmatpush1.bf16.msra.mxu1 %v4913_v14  ;;  %v4976_v13 = vcombine.high %v456_v6, %v460_v7  ;;  %v4978_v14 = vcombine.high %v457_v8, %v461_v9  ;;  %v512_v6 = vld [vmem:[#allocation5 + $0xd40] sm:$0xff]  ;;  %v513_v8 = vld [vmem:[#allocation5 + $0xd48] sm:$0xff] }
  0xf9   :  { %3326 = vmatprep.subr.bf16.mxu0 %v4920_v16  ;;  %3490 = vmatprep.subr.bf16.mxu1 %v4922_v17  ;;  %v464_v16 = vld [vmem:[#allocation5 + $0xbc0] sm:$0xff]  ;;  %v517_v9 = vld [vmem:[#allocation5 + $0xd68] sm:$0xff] }
  0xfa   :  { %v468_v17 = vld [vmem:[#allocation5 + $0xbe0] sm:$0xff] }
  0xfb   :  { %v4983_v30 = vcombine.low %v464_v16, %v468_v17  ;;  %v516_v7 = vld [vmem:[#allocation5 + $0xd60] sm:$0xff] }
  0xfc   :  { %3327 = vmatpush1.bf16.msra.mxu0 %v4919_v22  ;;  %3491 = vmatpush1.bf16.msra.mxu1 %v4921_v23  ;;  %v4984_v22 = vcombine.high %v464_v16, %v468_v17  ;;  %v4986_v23 = vcombine.high %v465_v18, %v469_v19  ;;  %v520_v16 = vld [vmem:[#allocation5 + $0xd80] sm:$0xff]  ;;  %v521_v18 = vld [vmem:[#allocation5 + $0xd88] sm:$0xff] }
  0xfd   :  { %3328 = vmatprep.subr.bf16.mxu0 %v4928_v26  ;;  %3492 = vmatprep.subr.bf16.mxu1 %v4930_v27  ;;  %v472_v26 = vld [vmem:[#allocation5 + $0xc00] sm:$0xff]  ;;  %v525_v19 = vld [vmem:[#allocation5 + $0xda8] sm:$0xff] }
  0xfe   :  { %v476_v27 = vld [vmem:[#allocation5 + $0xc20] sm:$0xff] }
  0xff   :  { %v524_v17 = vld [vmem:[#allocation5 + $0xda0] sm:$0xff] }
 0x100   :  { %3329 = vmatpush1.bf16.msra.mxu0 %v4927_v33  ;;  %3493 = vmatpush1.bf16.msra.mxu1 %v4929_v34  ;;  %v4992_v33 = vcombine.high %v472_v26, %v476_v27  ;;  %v4994_v34 = vcombine.high %v473_v28, %v477_v29 }
 0x101   :  { %3330 = vmatprep.subr.bf16.mxu0 %v4936_v15  ;;  %3494 = vmatprep.subr.bf16.mxu1 %v4938_v35  ;;  %v480_v15 = vld [vmem:[#allocation5 + $0xc40] sm:$0xff] }
 0x102   :  { %v484_v35 = vld [vmem:[#allocation5 + $0xc60] sm:$0xff] }
 0x104   :  { %3331 = vmatpush1.bf16.msra.mxu0 %v4935_v40  ;;  %3495 = vmatpush1.bf16.msra.mxu1 %v4937_v41  ;;  %v4991_v40 = vcombine.low %v472_v26, %v476_v27  ;;  %v4993_v41 = vcombine.low %v473_v28, %v477_v29  ;;  %v528_v26 = vld [vmem:[#allocation5 + $0xdc0] sm:$0xff]  ;;  %v529_v28 = vld [vmem:[#allocation5 + $0xdc8] sm:$0xff] }
 0x105   :  { %3332 = vmatprep.subr.bf16.mxu0 %v4944_v42  ;;  %3496 = vmatprep.subr.bf16.mxu1 %v4946_v43  ;;  %v5000_v42 = vcombine.high %v480_v15, %v484_v35  ;;  %v5002_v43 = vcombine.high %v481_v37, %v485_v38  ;;  %v532_v27 = vld [vmem:[#allocation5 + $0xde0] sm:$0xff]  ;;  %v533_v29 = vld [vmem:[#allocation5 + $0xde8] sm:$0xff] }
 0x108   :  { %3333 = vmatpush1.bf16.msra.mxu0 %v4943_v48  ;;  %3497 = vmatpush1.bf16.msra.mxu1 %v4945_v49  ;;  %v4999_v48 = vcombine.low %v480_v15, %v484_v35  ;;  %v5001_v49 = vcombine.low %v481_v37, %v485_v38  ;;  %v536_v15 = vld [vmem:[#allocation5 + $0xe00] sm:$0xff]  ;;  %v537_v37 = vld [vmem:[#allocation5 + $0xe08] sm:$0xff] }
 0x109   :  { %3334 = vmatprep.subr.bf16.mxu0 %v4952_v50  ;;  %3498 = vmatprep.subr.bf16.mxu1 %v4954_v51  ;;  %v5008_v50 = vcombine.high %v488_v44, %v492_v45  ;;  %v5010_v51 = vcombine.high %v489_v24, %v493_v47  ;;  %v540_v35 = vld [vmem:[#allocation5 + $0xe20] sm:$0xff]  ;;  %v541_v38 = vld [vmem:[#allocation5 + $0xe28] sm:$0xff] }
 0x10c   :  { %3335 = vmatpush1.bf16.msra.mxu0 %v4951_v58  ;;  %3499 = vmatpush1.bf16.msra.mxu1 %v4953_v59  ;;  %v5007_v58 = vcombine.low %v488_v44, %v492_v45  ;;  %v5009_v59 = vcombine.low %v489_v24, %v493_v47  ;;  %v544_v44 = vld [vmem:[#allocation5 + $0xe40] sm:$0xff]  ;;  %v545_v24 = vld [vmem:[#allocation5 + $0xe48] sm:$0xff] }
 0x10d   :  { %3336 = vmatprep.subr.bf16.mxu0 %v4960_v60  ;;  %3500 = vmatprep.subr.bf16.mxu1 %v4962_v61  ;;  %v5016_v60 = vcombine.high %v496_v52, %v500_v54  ;;  %v5018_v61 = vcombine.high %v497_v55, %v501_v56  ;;  %v548_v45 = vld [vmem:[#allocation5 + $0xe60] sm:$0xff]  ;;  %v549_v47 = vld [vmem:[#allocation5 + $0xe68] sm:$0xff] }
 0x110   :  { %3337 = vmatpush1.bf16.msra.mxu0 %v4959_v2  ;;  %3501 = vmatpush1.bf16.msra.mxu1 %v4961_v3  ;;  %v5015_v2 = vcombine.low %v496_v52, %v500_v54  ;;  %v5017_v3 = vcombine.low %v497_v55, %v501_v56  ;;  %v552_v52 = vld [vmem:[#allocation5 + $0xe80] sm:$0xff]  ;;  %v553_v55 = vld [vmem:[#allocation5 + $0xe88] sm:$0xff] }
 0x111   :  { %3338 = vmatprep.subr.bf16.mxu0 %v4968_v4  ;;  %3502 = vmatprep.subr.bf16.mxu1 %v4970_v5  ;;  %v5024_v4 = vcombine.high %v504_v62, %v508_v63  ;;  %v5026_v5 = vcombine.high %v505_v0, %v509_v1  ;;  %v556_v54 = vld [vmem:[#allocation5 + $0xea0] sm:$0xff]  ;;  %v557_v56 = vld [vmem:[#allocation5 + $0xea8] sm:$0xff] }
 0x114   :  { %3339 = vmatpush1.bf16.msra.mxu0 %v4967_v10  ;;  %3503 = vmatpush1.bf16.msra.mxu1 %v4969_v11  ;;  %v5023_v10 = vcombine.low %v504_v62, %v508_v63  ;;  %v5025_v11 = vcombine.low %v505_v0, %v509_v1  ;;  %v560_v62 = vld [vmem:[#allocation5 + $0xec0] sm:$0xff]  ;;  %v561_v0 = vld [vmem:[#allocation5 + $0xec8] sm:$0xff] }
 0x115   :  { %3340 = vmatprep.subr.bf16.mxu0 %v4976_v13  ;;  %3504 = vmatprep.subr.bf16.mxu1 %v4978_v14  ;;  %v5032_v13 = vcombine.high %v512_v6, %v516_v7  ;;  %v5034_v14 = vcombine.high %v513_v8, %v517_v9  ;;  %v564_v63 = vld [vmem:[#allocation5 + $0xee0] sm:$0xff]  ;;  %v565_v1 = vld [vmem:[#allocation5 + $0xee8] sm:$0xff] }
 0x118   :  { %3341 = vmatpush1.bf16.msra.mxu0 %v4975_v20  ;;  %3505 = vmatpush1.bf16.msra.mxu1 %v4977_v21  ;;  %v5031_v20 = vcombine.low %v512_v6, %v516_v7  ;;  %v5033_v21 = vcombine.low %v513_v8, %v517_v9  ;;  %v568_v6 = vld [vmem:[#allocation5 + $0xf00] sm:$0xff]  ;;  %v569_v8 = vld [vmem:[#allocation5 + $0xf08] sm:$0xff] }
 0x119   :  { %3342 = vmatprep.subr.bf16.mxu0 %v4984_v22  ;;  %3506 = vmatprep.subr.bf16.mxu1 %v4986_v23  ;;  %v5040_v22 = vcombine.high %v520_v16, %v524_v17  ;;  %v5042_v23 = vcombine.high %v521_v18, %v525_v19  ;;  %v572_v7 = vld [vmem:[#allocation5 + $0xf20] sm:$0xff]  ;;  %v573_v9 = vld [vmem:[#allocation5 + $0xf28] sm:$0xff] }
 0x11c   :  { %3343 = vmatpush1.bf16.msra.mxu0 %v4983_v30  ;;  %3507 = vmatpush1.bf16.msra.mxu1 %v4985_v31  ;;  %v5039_v30 = vcombine.low %v520_v16, %v524_v17  ;;  %v5041_v31 = vcombine.low %v521_v18, %v525_v19  ;;  %v576_v16 = vld [vmem:[#allocation5 + $0xf40] sm:$0xff]  ;;  %v577_v18 = vld [vmem:[#allocation5 + $0xf48] sm:$0xff] }
 0x11d   :  { %3353 = vmatprep.subr.bf16.mxu0 %v4992_v33  ;;  %3517 = vmatprep.subr.bf16.mxu1 %v4994_v34  ;;  %v5048_v33 = vcombine.high %v528_v26, %v532_v27  ;;  %v5050_v34 = vcombine.high %v529_v28, %v533_v29  ;;  %v580_v17 = vld [vmem:[#allocation5 + $0xf60] sm:$0xff]  ;;  %v581_v19 = vld [vmem:[#allocation5 + $0xf68] sm:$0xff] }
 0x11f   :  { %3345 = vmatmul.mubr.bf16.vlgmr.msra.gmra.mrb[0].mxu0 %v5688_v36  ;;  %3509 = vmatmul.mubr.bf16.vlgmr.msra.gmra.mrb[0].mxu1 %v5688_v36 }
 0x120   :  { %3354 = vmatpush1.bf16.msra.mxu0 %v4991_v40  ;;  %3518 = vmatpush1.bf16.msra.mxu1 %v4993_v41  ;;  %v5047_v40 = vcombine.low %v528_v26, %v532_v27  ;;  %v5049_v41 = vcombine.low %v529_v28, %v533_v29  ;;  %v584_v26 = vld [vmem:[#allocation5 + $0xf80] sm:$0xff]  ;;  %v585_v28 = vld [vmem:[#allocation5 + $0xf88] sm:$0xff] }
 0x121   :  { %3355 = vmatprep.subr.bf16.mxu0 %v5000_v42  ;;  %3519 = vmatprep.subr.bf16.mxu1 %v5002_v43  ;;  %v5056_v42 = vcombine.high %v536_v15, %v540_v35  ;;  %v5058_v43 = vcombine.high %v537_v37, %v541_v38  ;;  %v588_v27 = vld [vmem:[#allocation5 + $0xfa0] sm:$0xff]  ;;  %v589_v29 = vld [vmem:[#allocation5 + $0xfa8] sm:$0xff] }
 0x122   :  { %3385 = vmatprep.mubr.bf16.mxu0 %v5694_v46  ;;  %3549 = vmatprep.mubr.bf16.mxu1 %v5694_v46 }
 0x124   :  { %3356 = vmatpush1.bf16.msra.mxu0 %v4999_v48  ;;  %3520 = vmatpush1.bf16.msra.mxu1 %v5001_v49  ;;  %v5055_v48 = vcombine.low %v536_v15, %v540_v35  ;;  %v5057_v49 = vcombine.low %v537_v37, %v541_v38  ;;  %v592_v15 = vld [vmem:[#allocation5 + $0xfc0] sm:$0xff]  ;;  %v593_v37 = vld [vmem:[#allocation5 + $0xfc8] sm:$0xff] }
 0x125   :  { %3357 = vmatprep.subr.bf16.mxu0 %v5008_v50  ;;  %3521 = vmatprep.subr.bf16.mxu1 %v5010_v51  ;;  %v5064_v50 = vcombine.high %v544_v44, %v548_v45  ;;  %v5066_v51 = vcombine.high %v545_v24, %v549_v47  ;;  %v596_v35 = vld [vmem:[#allocation5 + $0xfe0] sm:$0xff]  ;;  %v597_v38 = vld [vmem:[#allocation5 + $0xfe8] sm:$0xff] }
 0x128   :  { %3358 = vmatpush1.bf16.msra.mxu0 %v5007_v58  ;;  %3522 = vmatpush1.bf16.msra.mxu1 %v5009_v59  ;;  %v5063_v58 = vcombine.low %v544_v44, %v548_v45  ;;  %v5065_v59 = vcombine.low %v545_v24, %v549_v47  ;;  %v90_v44 = vld [vmem:[#allocation5 + $0x10] sm:$0xff]  ;;  %v91_v24 = vld [vmem:[#allocation5 + $0x18] sm:$0xff] }
 0x129   :  { %3359 = vmatprep.subr.bf16.mxu0 %v5016_v60  ;;  %3523 = vmatprep.subr.bf16.mxu1 %v5018_v61  ;;  %v5072_v60 = vcombine.high %v552_v52, %v556_v54  ;;  %v5074_v61 = vcombine.high %v553_v55, %v557_v56  ;;  %v94_v45 = vld [vmem:[#allocation5 + $0x30] sm:$0xff]  ;;  %v95_v47 = vld [vmem:[#allocation5 + $0x38] sm:$0xff] }
 0x12c   :  { %3360 = vmatpush1.bf16.msra.mxu0 %v5015_v2  ;;  %3524 = vmatpush1.bf16.msra.mxu1 %v5017_v3  ;;  %v5071_v2 = vcombine.low %v552_v52, %v556_v54  ;;  %v5073_v3 = vcombine.low %v553_v55, %v557_v56  ;;  %v98_v52 = vld [vmem:[#allocation5 + $0x50] sm:$0xff]  ;;  %v5702_v55 = vcombine.low %v5690_v39, %v5690_v39  ;;  %v99_v56 = vld [vmem:[#allocation5 + $0x58] sm:$0xff] }
 0x12d   :  { %3361 = vmatprep.subr.bf16.mxu0 %v5024_v4  ;;  %3525 = vmatprep.subr.bf16.mxu1 %v5026_v5  ;;  %v5080_v4 = vcombine.high %v560_v62, %v564_v63  ;;  %v5082_v5 = vcombine.high %v561_v0, %v565_v1  ;;  %v102_v54 = vld [vmem:[#allocation5 + $0x70] sm:$0xff] }
 0x12e   :  { %v4619_v39 = vcombine.low %v98_v52, %v102_v54 }
 0x130   :  { %3362 = vmatpush1.bf16.msra.mxu0 %v5023_v10  ;;  %3526 = vmatpush1.bf16.msra.mxu1 %v5025_v11  ;;  %v5079_v10 = vcombine.low %v560_v62, %v564_v63  ;;  %v5081_v11 = vcombine.low %v561_v0, %v565_v1  ;;  %v106_v63 = vld [vmem:[#allocation5 + $0x90] sm:$0xff]  ;;  %v107_v1 = vld [vmem:[#allocation5 + $0x98] sm:$0xff] }
 0x131   :  { %3363 = vmatprep.subr.bf16.mxu0 %v5032_v13  ;;  %3527 = vmatprep.subr.bf16.mxu1 %v5034_v14  ;;  %v5088_v13 = vcombine.high %v568_v6, %v572_v7  ;;  %v5090_v14 = vcombine.high %v569_v8, %v573_v9  ;;  %v110_v0 = vld [vmem:[#allocation5 + $0xb0] sm:$0xff] }
 0x134   :  { %3364 = vmatpush1.bf16.msra.mxu0 %v5031_v20  ;;  %3528 = vmatpush1.bf16.msra.mxu1 %v5033_v21  ;;  %v5087_v20 = vcombine.low %v568_v6, %v572_v7  ;;  %v5089_v21 = vcombine.low %v569_v8, %v573_v9  ;;  %v114_v6 = vld [vmem:[#allocation5 + $0xd0] sm:$0xff]  ;;  %v115_v8 = vld [vmem:[#allocation5 + $0xd8] sm:$0xff] }
 0x135   :  { %3365 = vmatprep.subr.bf16.mxu0 %v5040_v22  ;;  %3529 = vmatprep.subr.bf16.mxu1 %v5042_v23  ;;  %v5096_v22 = vcombine.high %v576_v16, %v580_v17  ;;  %v5098_v23 = vcombine.high %v577_v18, %v581_v19  ;;  %v118_v7 = vld [vmem:[#allocation5 + $0xf0] sm:$0xff]  ;;  %v119_v9 = vld [vmem:[#allocation5 + $0xf8] sm:$0xff] }
 0x138   :  { %3366 = vmatpush1.bf16.msra.mxu0 %v5039_v30  ;;  %3530 = vmatpush1.bf16.msra.mxu1 %v5041_v31  ;;  %v5095_v30 = vcombine.low %v576_v16, %v580_v17  ;;  %v5097_v31 = vcombine.low %v577_v18, %v581_v19  ;;  %v122_v16 = vld [vmem:[#allocation5 + $0x110] sm:$0xff]  ;;  %v123_v18 = vld [vmem:[#allocation5 + $0x118] sm:$0xff] }
 0x139   :  { %3367 = vmatprep.subr.bf16.mxu0 %v5048_v33  ;;  %3531 = vmatprep.subr.bf16.mxu1 %v5050_v34  ;;  %v5104_v33 = vcombine.high %v584_v26, %v588_v27  ;;  %v5106_v34 = vcombine.high %v585_v28, %v589_v29  ;;  %v126_v17 = vld [vmem:[#allocation5 + $0x130] sm:$0xff]  ;;  %v127_v19 = vld [vmem:[#allocation5 + $0x138] sm:$0xff] }
 0x13c   :  { %3368 = vmatpush1.bf16.msra.mxu0 %v5047_v40  ;;  %3532 = vmatpush1.bf16.msra.mxu1 %v5049_v41  ;;  %v5103_v40 = vcombine.low %v584_v26, %v588_v27  ;;  %v5105_v41 = vcombine.low %v585_v28, %v589_v29  ;;  %v134_v26 = vld [vmem:[#allocation5 + $0x170] sm:$0xff]  ;;  %v131_v27 = vld [vmem:[#allocation5 + $0x158] sm:$0xff]  ;;  %v4643_v29 = vcombine.low %v122_v16, %v126_v17 }
 0x13d   :  { %3369 = vmatprep.subr.bf16.mxu0 %v5056_v42  ;;  %3533 = vmatprep.subr.bf16.mxu1 %v5058_v43  ;;  %v5112_v42 = vcombine.high %v592_v15, %v596_v35  ;;  %v5114_v43 = vcombine.high %v593_v37, %v597_v38  ;;  %v135_v28 = vld [vmem:[#allocation5 + $0x178] sm:$0xff] }
 0x140   :  { %3370 = vmatpush1.bf16.msra.mxu0 %v5055_v48  ;;  %3534 = vmatpush1.bf16.msra.mxu1 %v5057_v49  ;;  %v5111_v48 = vcombine.low %v592_v15, %v596_v35  ;;  %v5113_v49 = vcombine.low %v593_v37, %v597_v38  ;;  %v142_v15 = vld [vmem:[#allocation5 + $0x1b0] sm:$0xff]  ;;  %v139_v35 = vld [vmem:[#allocation5 + $0x198] sm:$0xff] }
 0x141   :  { %3371 = vmatprep.subr.bf16.mxu0 %v5064_v50  ;;  %3535 = vmatprep.subr.bf16.mxu1 %v5066_v51  ;;  %v4612_v50 = vcombine.high %v90_v44, %v94_v45  ;;  %v4614_v51 = vcombine.high %v91_v24, %v95_v47  ;;  %v143_v37 = vld [vmem:[#allocation5 + $0x1b8] sm:$0xff] }
 0x144   :  { %3372 = vmatpush1.bf16.msra.mxu0 %v5063_v58  ;;  %3536 = vmatpush1.bf16.msra.mxu1 %v5065_v59  ;;  %v103_v58 = vld [vmem:[#allocation5 + $0x78] sm:$0xff]  ;;  %v4611_v59 = vcombine.low %v90_v44, %v94_v45  ;;  %v150_v44 = vld [vmem:[#allocation5 + $0x1f0] sm:$0xff] }
 0x145   :  { %3373 = vmatprep.subr.bf16.mxu0 %v5072_v60  ;;  %3537 = vmatprep.subr.bf16.mxu1 %v5074_v61  ;;  %v4613_v60 = vcombine.low %v91_v24, %v95_v47  ;;  %v4620_v61 = vcombine.high %v98_v52, %v102_v54  ;;  %v4622_v62 = vcombine.high %v99_v56, %v103_v58  ;;  %v147_v45 = vld [vmem:[#allocation5 + $0x1d8] sm:$0xff]  ;;  %v158_v52 = vld [vmem:[#allocation5 + $0x230] sm:$0xff] }
 0x146   :  { %v151_v24 = vld [vmem:[#allocation5 + $0x1f8] sm:$0xff] }
 0x147   :  { %v155_v54 = vld [vmem:[#allocation5 + $0x218] sm:$0xff] }
 0x148   :  { %3374 = vmatpush1.bf16.msra.mxu0 %v5071_v2  ;;  %3538 = vmatpush1.bf16.msra.mxu1 %v5073_v3  ;;  %v111_v2 = vld [vmem:[#allocation5 + $0xb8] sm:$0xff]  ;;  %v4621_v3 = vcombine.low %v99_v56, %v103_v58 }
 0x149   :  { %3375 = vmatprep.subr.bf16.mxu0 %v5080_v4  ;;  %3539 = vmatprep.subr.bf16.mxu1 %v5082_v5  ;;  %v4628_v4 = vcombine.high %v106_v63, %v110_v0  ;;  %v4630_v5 = vcombine.high %v107_v1, %v111_v2  ;;  %v159_v56 = vld [vmem:[#allocation5 + $0x238] sm:$0xff] }
 0x14c   :  { %3376 = vmatpush1.bf16.msra.mxu0 %v5079_v10  ;;  %3540 = vmatpush1.bf16.msra.mxu1 %v5081_v11  ;;  %v4627_v10 = vcombine.low %v106_v63, %v110_v0  ;;  %v4629_v11 = vcombine.low %v107_v1, %v111_v2  ;;  %v166_v63 = vld [vmem:[#allocation5 + $0x270] sm:$0xff]  ;;  %v163_v0 = vld [vmem:[#allocation5 + $0x258] sm:$0xff] }
 0x14d   :  { %3377 = vmatprep.subr.bf16.mxu0 %v5088_v13  ;;  %3541 = vmatprep.subr.bf16.mxu1 %v5090_v14  ;;  %v4636_v13 = vcombine.high %v114_v6, %v118_v7  ;;  %v4638_v14 = vcombine.high %v115_v8, %v119_v9  ;;  %v167_v1 = vld [vmem:[#allocation5 + $0x278] sm:$0xff] }
 0x150   :  { %3378 = vmatpush1.bf16.msra.mxu0 %v5087_v20  ;;  %3542 = vmatpush1.bf16.msra.mxu1 %v5089_v21  ;;  %v4635_v20 = vcombine.low %v114_v6, %v118_v7  ;;  %v4637_v21 = vcombine.low %v115_v8, %v119_v9  ;;  %v174_v6 = vld [vmem:[#allocation5 + $0x2b0] sm:$0xff]  ;;  %v171_v7 = vld [vmem:[#allocation5 + $0x298] sm:$0xff] }
 0x151   :  { %3379 = vmatprep.subr.bf16.mxu0 %v5096_v22  ;;  %3543 = vmatprep.subr.bf16.mxu1 %v5098_v23  ;;  %v4644_v22 = vcombine.high %v122_v16, %v126_v17  ;;  %v130_v23 = vld [vmem:[#allocation5 + $0x150] sm:$0xff]  ;;  %v175_v8 = vld [vmem:[#allocation5 + $0x2b8] sm:$0xff] }
 0x152   :  { %v4651_v38 = vcombine.low %v130_v23, %v134_v26  ;;  %v182_v16 = vld [vmem:[#allocation5 + $0x2f0] sm:$0xff]  ;;  %v179_v17 = vld [vmem:[#allocation5 + $0x2d8] sm:$0xff] }
 0x154   :  { %3380 = vmatpush1.bf16.msra.mxu0 %v5095_v30  ;;  %3544 = vmatpush1.bf16.msra.mxu1 %v5097_v31  ;;  %v4645_v30 = vcombine.low %v123_v18, %v127_v19  ;;  %v4652_v31 = vcombine.high %v130_v23, %v134_v26  ;;  %v190_v23 = vld [vmem:[#allocation5 + $0x330] sm:$0xff]  ;;  %v187_v26 = vld [vmem:[#allocation5 + $0x318] sm:$0xff] }
 0x155   :  { %3381 = vmatprep.subr.bf16.mxu0 %v5104_v33  ;;  %3545 = vmatprep.subr.bf16.mxu1 %v5106_v34  ;;  %v4654_v33 = vcombine.high %v131_v27, %v135_v28  ;;  %v138_v34 = vld [vmem:[#allocation5 + $0x190] sm:$0xff] }
 0x156   :  { %v4659_v47 = vcombine.low %v138_v34, %v142_v15 }
 0x158   :  { %3382 = vmatpush1.bf16.msra.mxu0 %v5103_v40  ;;  %3546 = vmatpush1.bf16.msra.mxu1 %v5105_v41  ;;  %v4653_v40 = vcombine.low %v131_v27, %v135_v28  ;;  %v4660_v41 = vcombine.high %v138_v34, %v142_v15  ;;  %v191_v27 = vld [vmem:[#allocation5 + $0x338] sm:$0xff]  ;;  %v198_v34 = vld [vmem:[#allocation5 + $0x370] sm:$0xff] }
 0x159   :  { %3383 = vmatprep.subr.bf16.mxu0 %v5112_v42  ;;  %3547 = vmatprep.subr.bf16.mxu1 %v5114_v43  ;;  %v4662_v42 = vcombine.high %v139_v35, %v143_v37  ;;  %v146_v43 = vld [vmem:[#allocation5 + $0x1d0] sm:$0xff]  ;;  %v195_v15 = vld [vmem:[#allocation5 + $0x358] sm:$0xff] }
 0x15a   :  { %v4667_v58 = vcombine.low %v146_v43, %v150_v44 }
 0x15c   :  { %3384 = vmatpush1.bf16.msra.mxu0 %v5111_v48  ;;  %3548 = vmatpush1.bf16.msra.mxu1 %v5113_v49  ;;  %v4661_v48 = vcombine.low %v139_v35, %v143_v37  ;;  %v4668_v49 = vcombine.high %v146_v43, %v150_v44  ;;  %v199_v35 = vld [vmem:[#allocation5 + $0x378] sm:$0xff]  ;;  %v206_v43 = vld [vmem:[#allocation5 + $0x3b0] sm:$0xff] }
 0x15d   :  { %3558 = vmatprep.subr.bf16.mxu0 %v4612_v50  ;;  %3722 = vmatprep.subr.bf16.mxu1 %v4614_v51  ;;  %v4670_v50 = vcombine.high %v147_v45, %v151_v24  ;;  %v154_v51 = vld [vmem:[#allocation5 + $0x210] sm:$0xff]  ;;  %v203_v44 = vld [vmem:[#allocation5 + $0x398] sm:$0xff] }
 0x15e   :  { %v4675_v2 = vcombine.low %v154_v51, %v158_v52 }
 0x15f   :  { %3386 = vmatmul.mubr.bf16.vlgmr.msra.gmra.mrb[0].mxu0 %v5702_v55  ;;  %3550 = vmatmul.mubr.bf16.vlgmr.msra.gmra.mrb[0].mxu1 %v5702_v55 }
 0x160   :  { %3559 = vmatpush1.bf16.msra.mxu0 %v4611_v59  ;;  %3723 = vmatpush1.bf16.msra.mxu1 %v4613_v60  ;;  %v4669_v59 = vcombine.low %v147_v45, %v151_v24  ;;  %v4676_v60 = vcombine.high %v154_v51, %v158_v52  ;;  %v207_v45 = vld [vmem:[#allocation5 + $0x3b8] sm:$0xff]  ;;  %v214_v51 = vld [vmem:[#allocation5 + $0x3f0] sm:$0xff] }
 0x161   :  { %3560 = vmatprep.subr.bf16.mxu0 %v4620_v61  ;;  %3724 = vmatprep.subr.bf16.mxu1 %v4622_v62  ;;  %v4678_v61 = vcombine.high %v155_v54, %v159_v56  ;;  %v162_v62 = vld [vmem:[#allocation5 + $0x250] sm:$0xff]  ;;  %v211_v52 = vld [vmem:[#allocation5 + $0x3d8] sm:$0xff] }
 0x162   :  { %3590 = vmatprep.mubr.bf16.mxu0 %v5654_v57  ;;  %3754 = vmatprep.mubr.bf16.mxu1 %v5654_v57  ;;  %v4646_v57 = vcombine.high %v123_v18, %v127_v19  ;;  %v4683_v9 = vcombine.low %v162_v62, %v166_v63  ;;  %v183_v18 = vld [vmem:[#allocation5 + $0x2f8] sm:$0xff] }
 0x164   :  { %3561 = vmatpush1.bf16.msra.mxu0 %v4619_v39  ;;  %3725 = vmatpush1.bf16.msra.mxu1 %v4621_v3  ;;  %v4677_v39 = vcombine.low %v155_v54, %v159_v56  ;;  %v4684_v3 = vcombine.high %v162_v62, %v166_v63  ;;  %v215_v54 = vld [vmem:[#allocation5 + $0x3f8] sm:$0xff]  ;;  %v222_v62 = vld [vmem:[#allocation5 + $0x430] sm:$0xff] }
 0x165   :  { %3562 = vmatprep.subr.bf16.mxu0 %v4628_v4  ;;  %3726 = vmatprep.subr.bf16.mxu1 %v4630_v5  ;;  %v4686_v4 = vcombine.high %v163_v0, %v167_v1  ;;  %v170_v5 = vld [vmem:[#allocation5 + $0x290] sm:$0xff]  ;;  %v219_v63 = vld [vmem:[#allocation5 + $0x418] sm:$0xff] }
 0x166   :  { %v4691_v19 = vcombine.low %v170_v5, %v174_v6 }
 0x168   :  { %3563 = vmatpush1.bf16.msra.mxu0 %v4627_v10  ;;  %3727 = vmatpush1.bf16.msra.mxu1 %v4629_v11  ;;  %v4685_v10 = vcombine.low %v163_v0, %v167_v1  ;;  %v4692_v11 = vcombine.high %v170_v5, %v174_v6  ;;  %v223_v0 = vld [vmem:[#allocation5 + $0x438] sm:$0xff]  ;;  %v230_v5 = vld [vmem:[#allocation5 + $0x470] sm:$0xff] }
 0x169   :  { %3564 = vmatprep.subr.bf16.mxu0 %v4636_v13  ;;  %3728 = vmatprep.subr.bf16.mxu1 %v4638_v14  ;;  %v4694_v13 = vcombine.high %v171_v7, %v175_v8  ;;  %v178_v14 = vld [vmem:[#allocation5 + $0x2d0] sm:$0xff]  ;;  %v227_v6 = vld [vmem:[#allocation5 + $0x458] sm:$0xff] }
 0x16a   :  { %v4699_v28 = vcombine.low %v178_v14, %v182_v16 }
 0x16c   :  { %3565 = vmatpush1.bf16.msra.mxu0 %v4635_v20  ;;  %3729 = vmatpush1.bf16.msra.mxu1 %v4637_v21  ;;  %v4693_v20 = vcombine.low %v171_v7, %v175_v8  ;;  %v4700_v21 = vcombine.high %v178_v14, %v182_v16  ;;  %v231_v7 = vld [vmem:[#allocation5 + $0x478] sm:$0xff]  ;;  %v238_v14 = vld [vmem:[#allocation5 + $0x4b0] sm:$0xff] }
 0x16d   :  { %3566 = vmatprep.subr.bf16.mxu0 %v4644_v22  ;;  %3730 = vmatprep.subr.bf16.mxu1 %v4646_v57  ;;  %v4702_v22 = vcombine.high %v179_v17, %v183_v18  ;;  %v186_v57 = vld [vmem:[#allocation5 + $0x310] sm:$0xff]  ;;  %v235_v16 = vld [vmem:[#allocation5 + $0x498] sm:$0xff] }
 0x16e   :  { %v4707_v37 = vcombine.low %v186_v57, %v190_v23 }
 0x170   :  { %3567 = vmatpush1.bf16.msra.mxu0 %v4643_v29  ;;  %3731 = vmatpush1.bf16.msra.mxu1 %v4645_v30  ;;  %v4701_v29 = vcombine.low %v179_v17, %v183_v18  ;;  %v4708_v30 = vcombine.high %v186_v57, %v190_v23  ;;  %v239_v17 = vld [vmem:[#allocation5 + $0x4b8] sm:$0xff]  ;;  %v246_v57 = vld [vmem:[#allocation5 + $0x4f0] sm:$0xff] }
 0x171   :  { %3568 = vmatprep.subr.bf16.mxu0 %v4652_v31  ;;  %3732 = vmatprep.subr.bf16.mxu1 %v4654_v33  ;;  %v4710_v31 = vcombine.high %v187_v26, %v191_v27  ;;  %v194_v33 = vld [vmem:[#allocation5 + $0x350] sm:$0xff]  ;;  %v243_v23 = vld [vmem:[#allocation5 + $0x4d8] sm:$0xff] }
 0x172   :  { %v4715_v24 = vcombine.low %v194_v33, %v198_v34 }
 0x174   :  { %3569 = vmatpush1.bf16.msra.mxu0 %v4651_v38  ;;  %3733 = vmatpush1.bf16.msra.mxu1 %v4653_v40  ;;  %v4709_v38 = vcombine.low %v187_v26, %v191_v27  ;;  %v4716_v40 = vcombine.high %v194_v33, %v198_v34  ;;  %v247_v26 = vld [vmem:[#allocation5 + $0x4f8] sm:$0xff] }
 0x175   :  { %3570 = vmatprep.subr.bf16.mxu0 %v4660_v41  ;;  %3734 = vmatprep.subr.bf16.mxu1 %v4662_v42  ;;  %v4718_v41 = vcombine.high %v195_v15, %v199_v35  ;;  %v202_v42 = vld [vmem:[#allocation5 + $0x390] sm:$0xff]  ;;  %v251_v33 = vld [vmem:[#allocation5 + $0x518] sm:$0xff] }
 0x176   :  { %v4723_v56 = vcombine.low %v202_v42, %v206_v43  ;;  %v255_v34 = vld [vmem:[#allocation5 + $0x538] sm:$0xff] }
 0x178   :  { %3571 = vmatpush1.bf16.msra.mxu0 %v4659_v47  ;;  %3735 = vmatpush1.bf16.msra.mxu1 %v4661_v48  ;;  %v4717_v47 = vcombine.low %v195_v15, %v199_v35  ;;  %v4724_v48 = vcombine.high %v202_v42, %v206_v43  ;;  %v4765_v35 = vcombine.low %v243_v23, %v247_v26  ;;  %v263_v42 = vld [vmem:[#allocation5 + $0x578] sm:$0xff] }
 0x179   :  { %3572 = vmatprep.subr.bf16.mxu0 %v4668_v49  ;;  %3736 = vmatprep.subr.bf16.mxu1 %v4670_v50  ;;  %v4726_v49 = vcombine.high %v203_v44, %v207_v45  ;;  %v210_v50 = vld [vmem:[#allocation5 + $0x3d0] sm:$0xff] }
 0x17a   :  { %v4731_v1 = vcombine.low %v210_v50, %v214_v51 }
 0x17c   :  { %3573 = vmatpush1.bf16.msra.mxu0 %v4667_v58  ;;  %3737 = vmatpush1.bf16.msra.mxu1 %v4669_v59  ;;  %v4725_v58 = vcombine.low %v203_v44, %v207_v45  ;;  %v4732_v59 = vcombine.high %v210_v50, %v214_v51  ;;  %v4773_v44 = vcombine.low %v251_v33, %v255_v34  ;;  %v271_v50 = vld [vmem:[#allocation5 + $0x5b8] sm:$0xff] }
 0x17d   :  { %3574 = vmatprep.subr.bf16.mxu0 %v4676_v60  ;;  %3738 = vmatprep.subr.bf16.mxu1 %v4678_v61  ;;  %v4734_v60 = vcombine.high %v211_v52, %v215_v54  ;;  %v218_v61 = vld [vmem:[#allocation5 + $0x410] sm:$0xff] }
 0x17e   :  { %v4739_v8 = vcombine.low %v218_v61, %v222_v62 }
 0x180   :  { %3575 = vmatpush1.bf16.msra.mxu0 %v4675_v2  ;;  %3739 = vmatpush1.bf16.msra.mxu1 %v4677_v39  ;;  %v4733_v2 = vcombine.low %v211_v52, %v215_v54  ;;  %v4740_v39 = vcombine.high %v218_v61, %v222_v62  ;;  %v279_v61 = vld [vmem:[#allocation5 + $0x5f8] sm:$0xff] }
 0x181   :  { %3576 = vmatprep.subr.bf16.mxu0 %v4684_v3  ;;  %3740 = vmatprep.subr.bf16.mxu1 %v4686_v4  ;;  %v4742_v3 = vcombine.high %v219_v63, %v223_v0  ;;  %v226_v4 = vld [vmem:[#allocation5 + $0x450] sm:$0xff] }
 0x182   :  { %v4747_v18 = vcombine.low %v226_v4, %v230_v5 }
 0x184   :  { %3577 = vmatpush1.bf16.msra.mxu0 %v4683_v9  ;;  %3741 = vmatpush1.bf16.msra.mxu1 %v4685_v10  ;;  %v4741_v9 = vcombine.low %v219_v63, %v223_v0  ;;  %v4748_v10 = vcombine.high %v226_v4, %v230_v5  ;;  %v287_v4 = vld [vmem:[#allocation5 + $0x638] sm:$0xff] }
 0x185   :  { %3578 = vmatprep.subr.bf16.mxu0 %v4692_v11  ;;  %3742 = vmatprep.subr.bf16.mxu1 %v4694_v13  ;;  %v4750_v11 = vcombine.high %v227_v6, %v231_v7  ;;  %v234_v13 = vld [vmem:[#allocation5 + $0x490] sm:$0xff] }
 0x186   :  { %v4755_v27 = vcombine.low %v234_v13, %v238_v14 }
 0x188   :  { %3579 = vmatpush1.bf16.msra.mxu0 %v4691_v19  ;;  %3743 = vmatpush1.bf16.msra.mxu1 %v4693_v20  ;;  %v4749_v19 = vcombine.low %v227_v6, %v231_v7  ;;  %v4756_v20 = vcombine.high %v234_v13, %v238_v14  ;;  %v295_v13 = vld [vmem:[#allocation5 + $0x678] sm:$0xff] }
 0x189   :  { %3580 = vmatprep.subr.bf16.mxu0 %v4700_v21  ;;  %3744 = vmatprep.subr.bf16.mxu1 %v4702_v22  ;;  %v4758_v21 = vcombine.high %v235_v16, %v239_v17  ;;  %v242_v22 = vld [vmem:[#allocation5 + $0x4d0] sm:$0xff] }
 0x18a   :  { %v4763_v15 = vcombine.low %v242_v22, %v246_v57 }
 0x18c   :  { %3581 = vmatpush1.bf16.msra.mxu0 %v4699_v28  ;;  %3745 = vmatpush1.bf16.msra.mxu1 %v4701_v29  ;;  %v4764_v28 = vcombine.high %v242_v22, %v246_v57  ;;  %v4766_v29 = vcombine.high %v243_v23, %v247_v26  ;;  %v303_v22 = vld [vmem:[#allocation5 + $0x6b8] sm:$0xff] }
 0x18d   :  { %3582 = vmatprep.subr.bf16.mxu0 %v4708_v30  ;;  %3746 = vmatprep.subr.bf16.mxu1 %v4710_v31  ;;  %v250_v30 = vld [vmem:[#allocation5 + $0x510] sm:$0xff] }
 0x18e   :  { %v254_v31 = vld [vmem:[#allocation5 + $0x530] sm:$0xff] }
 0x18f   :  { %v4771_v43 = vcombine.low %v250_v30, %v254_v31 }
 0x190   :  { %3583 = vmatpush1.bf16.msra.mxu0 %v4707_v37  ;;  %3747 = vmatpush1.bf16.msra.mxu1 %v4709_v38  ;;  %v4772_v37 = vcombine.high %v250_v30, %v254_v31  ;;  %v258_v38 = vld [vmem:[#allocation5 + $0x550] sm:$0xff]  ;;  %v311_v30 = vld [vmem:[#allocation5 + $0x6f8] sm:$0xff] }
 0x191   :  { %3584 = vmatprep.subr.bf16.mxu0 %v4716_v40  ;;  %3748 = vmatprep.subr.bf16.mxu1 %v4718_v41  ;;  %v262_v40 = vld [vmem:[#allocation5 + $0x570] sm:$0xff]  ;;  %v259_v41 = vld [vmem:[#allocation5 + $0x558] sm:$0xff] }
 0x192   :  { %v4780_v45 = vcombine.high %v258_v38, %v262_v40  ;;  %v4779_v51 = vcombine.low %v258_v38, %v262_v40  ;;  %v4781_v52 = vcombine.low %v259_v41, %v263_v42  ;;  %v319_v38 = vld [vmem:[#allocation5 + $0x738] sm:$0xff] }
 0x194   :  { %3585 = vmatpush1.bf16.msra.mxu0 %v4715_v24  ;;  %3749 = vmatpush1.bf16.msra.mxu1 %v4717_v47  ;;  %v4782_v24 = vcombine.high %v259_v41, %v263_v42  ;;  %v266_v47 = vld [vmem:[#allocation5 + $0x590] sm:$0xff] }
 0x195   :  { %3586 = vmatprep.subr.bf16.mxu0 %v4724_v48  ;;  %3750 = vmatprep.subr.bf16.mxu1 %v4726_v49  ;;  %v270_v48 = vld [vmem:[#allocation5 + $0x5b0] sm:$0xff]  ;;  %v267_v49 = vld [vmem:[#allocation5 + $0x598] sm:$0xff] }
 0x196   :  { %v4788_v54 = vcombine.high %v266_v47, %v270_v48  ;;  %v4787_v62 = vcombine.low %v266_v47, %v270_v48  ;;  %v4789_v63 = vcombine.low %v267_v49, %v271_v50  ;;  %v327_v47 = vld [vmem:[#allocation5 + $0x778] sm:$0xff] }
 0x198   :  { %3587 = vmatpush1.bf16.msra.mxu0 %v4723_v56  ;;  %3751 = vmatpush1.bf16.msra.mxu1 %v4725_v58  ;;  %v4790_v56 = vcombine.high %v267_v49, %v271_v50  ;;  %v274_v58 = vld [vmem:[#allocation5 + $0x5d0] sm:$0xff] }
 0x199   :  { %3588 = vmatprep.subr.bf16.mxu0 %v4732_v59  ;;  %3752 = vmatprep.subr.bf16.mxu1 %v4734_v60  ;;  %v278_v59 = vld [vmem:[#allocation5 + $0x5f0] sm:$0xff]  ;;  %v275_v60 = vld [vmem:[#allocation5 + $0x5d8] sm:$0xff] }
 0x19a   :  { %v4796_v0 = vcombine.high %v274_v58, %v278_v59  ;;  %v4795_v5 = vcombine.low %v274_v58, %v278_v59  ;;  %v4797_v6 = vcombine.low %v275_v60, %v279_v61  ;;  %v335_v58 = vld [vmem:[#allocation5 + $0x7b8] sm:$0xff] }
 0x19c   :  { %3589 = vmatpush1.bf16.msra.mxu0 %v4731_v1  ;;  %3753 = vmatpush1.bf16.msra.mxu1 %v4733_v2  ;;  %v4798_v1 = vcombine.high %v275_v60, %v279_v61  ;;  %v282_v2 = vld [vmem:[#allocation5 + $0x610] sm:$0xff] }
 0x19d   :  { %3599 = vmatprep.subr.bf16.mxu0 %v4740_v39  ;;  %3763 = vmatprep.subr.bf16.mxu1 %v4742_v3  ;;  %v286_v39 = vld [vmem:[#allocation5 + $0x630] sm:$0xff]  ;;  %v283_v3 = vld [vmem:[#allocation5 + $0x618] sm:$0xff] }
 0x19e   :  { %v4804_v7 = vcombine.high %v282_v2, %v286_v39  ;;  %v4803_v14 = vcombine.low %v282_v2, %v286_v39  ;;  %v343_v2 = vld [vmem:[#allocation5 + $0x7f8] sm:$0xff] }
 0x19f   :  { %3591 = vmatmul.mubr.bf16.vlgmr.msra.gmra.mrb[4].mxu0 %v5660_v12  ;;  %3755 = vmatmul.mubr.bf16.vlgmr.msra.gmra.mrb[4].mxu1 %v5660_v12  ;;  %v4757_v12 = vcombine.low %v235_v16, %v239_v17  ;;  %v4805_v16 = vcombine.low %v283_v3, %v287_v4 }
 0x1a0   :  { %3600 = vmatpush1.bf16.msra.mxu0 %v4739_v8  ;;  %3764 = vmatpush1.bf16.msra.mxu1 %v4741_v9  ;;  %v4806_v8 = vcombine.high %v283_v3, %v287_v4  ;;  %v290_v9 = vld [vmem:[#allocation5 + $0x650] sm:$0xff] }
 0x1a1   :  { %3601 = vmatprep.subr.bf16.mxu0 %v4748_v10  ;;  %3765 = vmatprep.subr.bf16.mxu1 %v4750_v11  ;;  %v294_v10 = vld [vmem:[#allocation5 + $0x670] sm:$0xff]  ;;  %v291_v11 = vld [vmem:[#allocation5 + $0x658] sm:$0xff] }
 0x1a2   :  { %3631 = vmatprep.mubr.bf16.mxu0 %v5666_v53  ;;  %3795 = vmatprep.mubr.bf16.mxu1 %v5666_v53  ;;  %v4774_v53 = vcombine.high %v251_v33, %v255_v34  ;;  %v4812_v17 = vcombine.high %v290_v9, %v294_v10  ;;  %v4811_v57 = vcombine.low %v290_v9, %v294_v10  ;;  %v351_v9 = vld [vmem:[#allocation5 + $0x838] sm:$0xff] }
 0x1a3   :  { %v4813_v23 = vcombine.low %v291_v11, %v295_v13 }
 0x1a4   :  { %3602 = vmatpush1.bf16.msra.mxu0 %v4747_v18  ;;  %3766 = vmatpush1.bf16.msra.mxu1 %v4749_v19  ;;  %v4814_v18 = vcombine.high %v291_v11, %v295_v13  ;;  %v298_v19 = vld [vmem:[#allocation5 + $0x690] sm:$0xff] }
 0x1a5   :  { %3603 = vmatprep.subr.bf16.mxu0 %v4756_v20  ;;  %3767 = vmatprep.subr.bf16.mxu1 %v4758_v21  ;;  %v302_v20 = vld [vmem:[#allocation5 + $0x6b0] sm:$0xff]  ;;  %v299_v21 = vld [vmem:[#allocation5 + $0x698] sm:$0xff] }
 0x1a6   :  { %v4820_v26 = vcombine.high %v298_v19, %v302_v20  ;;  %v4819_v31 = vcombine.low %v298_v19, %v302_v20  ;;  %v4821_v33 = vcombine.low %v299_v21, %v303_v22  ;;  %v359_v19 = vld [vmem:[#allocation5 + $0x878] sm:$0xff] }
 0x1a8   :  { %3604 = vmatpush1.bf16.msra.mxu0 %v4755_v27  ;;  %3768 = vmatpush1.bf16.msra.mxu1 %v4757_v12  ;;  %v4822_v27 = vcombine.high %v299_v21, %v303_v22  ;;  %v306_v12 = vld [vmem:[#allocation5 + $0x6d0] sm:$0xff] }
 0x1a9   :  { %3605 = vmatprep.subr.bf16.mxu0 %v4764_v28  ;;  %3769 = vmatprep.subr.bf16.mxu1 %v4766_v29  ;;  %v310_v28 = vld [vmem:[#allocation5 + $0x6f0] sm:$0xff]  ;;  %v307_v29 = vld [vmem:[#allocation5 + $0x6d8] sm:$0xff] }
 0x1aa   :  { %v4828_v34 = vcombine.high %v306_v12, %v310_v28  ;;  %v4827_v40 = vcombine.low %v306_v12, %v310_v28  ;;  %v4829_v41 = vcombine.low %v307_v29, %v311_v30  ;;  %v367_v12 = vld [vmem:[#allocation5 + $0x8b8] sm:$0xff] }
 0x1ac   :  { %3606 = vmatpush1.bf16.msra.mxu0 %v4763_v15  ;;  %3770 = vmatpush1.bf16.msra.mxu1 %v4765_v35  ;;  %v4830_v15 = vcombine.high %v307_v29, %v311_v30  ;;  %v314_v35 = vld [vmem:[#allocation5 + $0x710] sm:$0xff] }
 0x1ad   :  { %3607 = vmatprep.subr.bf16.mxu0 %v4772_v37  ;;  %3771 = vmatprep.subr.bf16.mxu1 %v4774_v53  ;;  %v318_v37 = vld [vmem:[#allocation5 + $0x730] sm:$0xff]  ;;  %v315_v53 = vld [vmem:[#allocation5 + $0x718] sm:$0xff] }
 0x1ae   :  { %v4836_v42 = vcombine.high %v314_v35, %v318_v37  ;;  %v4835_v48 = vcombine.low %v314_v35, %v318_v37  ;;  %v4837_v49 = vcombine.low %v315_v53, %v319_v38  ;;  %v375_v35 = vld [vmem:[#allocation5 + $0x8f8] sm:$0xff] }
 0x1b0   :  { %3608 = vmatpush1.bf16.msra.mxu0 %v4771_v43  ;;  %3772 = vmatpush1.bf16.msra.mxu1 %v4773_v44  ;;  %v4838_v43 = vcombine.high %v315_v53, %v319_v38  ;;  %v322_v44 = vld [vmem:[#allocation5 + $0x750] sm:$0xff] }
 0x1b1   :  { %3609 = vmatprep.subr.bf16.mxu0 %v4780_v45  ;;  %3773 = vmatprep.subr.bf16.mxu1 %v4782_v24  ;;  %v326_v45 = vld [vmem:[#allocation5 + $0x770] sm:$0xff]  ;;  %v323_v24 = vld [vmem:[#allocation5 + $0x758] sm:$0xff] }
 0x1b2   :  { %v4844_v50 = vcombine.high %v322_v44, %v326_v45  ;;  %v4843_v59 = vcombine.low %v322_v44, %v326_v45  ;;  %v4845_v60 = vcombine.low %v323_v24, %v327_v47 }
 0x1b4   :  { %3610 = vmatpush1.bf16.msra.mxu0 %v4779_v51  ;;  %3774 = vmatpush1.bf16.msra.mxu1 %v4781_v52  ;;  %v4846_v51 = vcombine.high %v323_v24, %v327_v47  ;;  %v330_v52 = vld [vmem:[#allocation5 + $0x790] sm:$0xff] }
 0x1b5   :  { %3611 = vmatprep.subr.bf16.mxu0 %v4788_v54  ;;  %3775 = vmatprep.subr.bf16.mxu1 %v4790_v56  ;;  %v334_v54 = vld [vmem:[#allocation5 + $0x7b0] sm:$0xff]  ;;  %v331_v56 = vld [vmem:[#allocation5 + $0x798] sm:$0xff] }
 0x1b6   :  { %v4852_v61 = vcombine.high %v330_v52, %v334_v54  ;;  %v4851_v39 = vcombine.low %v330_v52, %v334_v54  ;;  %v4853_v3 = vcombine.low %v331_v56, %v335_v58  ;;  %v386_v47 = vld [vmem:[#allocation5 + $0x950] sm:$0xff] }
 0x1b8   :  { %3612 = vmatpush1.bf16.msra.mxu0 %v4787_v62  ;;  %3776 = vmatpush1.bf16.msra.mxu1 %v4789_v63  ;;  %v4854_v62 = vcombine.high %v331_v56, %v335_v58  ;;  %v338_v63 = vld [vmem:[#allocation5 + $0x7d0] sm:$0xff] }
 0x1b9   :  { %3613 = vmatprep.subr.bf16.mxu0 %v4796_v0  ;;  %3777 = vmatprep.subr.bf16.mxu1 %v4798_v1  ;;  %v342_v0 = vld [vmem:[#allocation5 + $0x7f0] sm:$0xff]  ;;  %v339_v1 = vld [vmem:[#allocation5 + $0x7d8] sm:$0xff] }
 0x1ba   :  { %v4860_v4 = vcombine.high %v338_v63, %v342_v0  ;;  %v4859_v10 = vcombine.low %v338_v63, %v342_v0  ;;  %v4861_v11 = vcombine.low %v339_v1, %v343_v2  ;;  %v394_v58 = vld [vmem:[#allocation5 + $0x990] sm:$0xff] }
 0x1bc   :  { %3614 = vmatpush1.bf16.msra.mxu0 %v4795_v5  ;;  %3778 = vmatpush1.bf16.msra.mxu1 %v4797_v6  ;;  %v4862_v5 = vcombine.high %v339_v1, %v343_v2  ;;  %v346_v6 = vld [vmem:[#allocation5 + $0x810] sm:$0xff] }
 0x1bd   :  { %3615 = vmatprep.subr.bf16.mxu0 %v4804_v7  ;;  %3779 = vmatprep.subr.bf16.mxu1 %v4806_v8  ;;  %v350_v7 = vld [vmem:[#allocation5 + $0x830] sm:$0xff]  ;;  %v347_v8 = vld [vmem:[#allocation5 + $0x818] sm:$0xff] }
 0x1be   :  { %v4868_v13 = vcombine.high %v346_v6, %v350_v7  ;;  %v4867_v20 = vcombine.low %v346_v6, %v350_v7  ;;  %v4869_v21 = vcombine.low %v347_v8, %v351_v9  ;;  %v402_v2 = vld [vmem:[#allocation5 + $0x9d0] sm:$0xff] }
 0x1c0   :  { %3616 = vmatpush1.bf16.msra.mxu0 %v4803_v14  ;;  %3780 = vmatpush1.bf16.msra.mxu1 %v4805_v16  ;;  %v4870_v14 = vcombine.high %v347_v8, %v351_v9  ;;  %v354_v16 = vld [vmem:[#allocation5 + $0x850] sm:$0xff] }
 0x1c1   :  { %3617 = vmatprep.subr.bf16.mxu0 %v4812_v17  ;;  %3781 = vmatprep.subr.bf16.mxu1 %v4814_v18  ;;  %v358_v17 = vld [vmem:[#allocation5 + $0x870] sm:$0xff]  ;;  %v355_v18 = vld [vmem:[#allocation5 + $0x858] sm:$0xff] }
 0x1c2   :  { %v4876_v22 = vcombine.high %v354_v16, %v358_v17  ;;  %v4875_v28 = vcombine.low %v354_v16, %v358_v17  ;;  %v4877_v29 = vcombine.low %v355_v18, %v359_v19  ;;  %v410_v9 = vld [vmem:[#allocation5 + $0xa10] sm:$0xff] }
 0x1c4   :  { %3618 = vmatpush1.bf16.msra.mxu0 %v4811_v57  ;;  %3782 = vmatpush1.bf16.msra.mxu1 %v4813_v23  ;;  %v4878_v57 = vcombine.high %v355_v18, %v359_v19  ;;  %v362_v23 = vld [vmem:[#allocation5 + $0x890] sm:$0xff] }
 0x1c5   :  { %3619 = vmatprep.subr.bf16.mxu0 %v4820_v26  ;;  %3783 = vmatprep.subr.bf16.mxu1 %v4822_v27  ;;  %v366_v26 = vld [vmem:[#allocation5 + $0x8b0] sm:$0xff]  ;;  %v363_v27 = vld [vmem:[#allocation5 + $0x898] sm:$0xff] }
 0x1c6   :  { %v4884_v30 = vcombine.high %v362_v23, %v366_v26  ;;  %v4883_v37 = vcombine.low %v362_v23, %v366_v26  ;;  %v418_v19 = vld [vmem:[#allocation5 + $0xa50] sm:$0xff] }
 0x1c8   :  { %3620 = vmatpush1.bf16.msra.mxu0 %v4819_v31  ;;  %3784 = vmatpush1.bf16.msra.mxu1 %v4821_v33  ;;  %v4886_v31 = vcombine.high %v363_v27, %v367_v12  ;;  %v370_v33 = vld [vmem:[#allocation5 + $0x8d0] sm:$0xff] }
 0x1c9   :  { %3621 = vmatprep.subr.bf16.mxu0 %v4828_v34  ;;  %3785 = vmatprep.subr.bf16.mxu1 %v4830_v15  ;;  %v374_v34 = vld [vmem:[#allocation5 + $0x8f0] sm:$0xff]  ;;  %v371_v15 = vld [vmem:[#allocation5 + $0x8d8] sm:$0xff] }
 0x1ca   :  { %v4892_v53 = vcombine.high %v370_v33, %v374_v34  ;;  %v4894_v38 = vcombine.high %v371_v15, %v375_v35  ;;  %v4891_v44 = vcombine.low %v370_v33, %v374_v34  ;;  %v4893_v45 = vcombine.low %v371_v15, %v375_v35  ;;  %v434_v35 = vld [vmem:[#allocation5 + $0xad0] sm:$0xff] }
 0x1cc   :  { %3622 = vmatpush1.bf16.msra.mxu0 %v4827_v40  ;;  %3786 = vmatpush1.bf16.msra.mxu1 %v4829_v41  ;;  %v378_v40 = vld [vmem:[#allocation5 + $0x910] sm:$0xff] }
 0x1cd   :  { %3623 = vmatprep.subr.bf16.mxu0 %v4836_v42  ;;  %3787 = vmatprep.subr.bf16.mxu1 %v4838_v43  ;;  %v382_v41 = vld [vmem:[#allocation5 + $0x930] sm:$0xff]  ;;  %v379_v42 = vld [vmem:[#allocation5 + $0x918] sm:$0xff] }
 0x1ce   :  { %v383_v43 = vld [vmem:[#allocation5 + $0x938] sm:$0xff]  ;;  %v4900_v24 = vcombine.high %v378_v40, %v382_v41 }
 0x1cf   :  { %v4901_v52 = vcombine.low %v379_v42, %v383_v43 }
 0x1d0   :  { %3624 = vmatpush1.bf16.msra.mxu0 %v4835_v48  ;;  %3788 = vmatpush1.bf16.msra.mxu1 %v4837_v49  ;;  %v390_v48 = vld [vmem:[#allocation5 + $0x970] sm:$0xff]  ;;  %v387_v49 = vld [vmem:[#allocation5 + $0x958] sm:$0xff] }
 0x1d1   :  { %3625 = vmatprep.subr.bf16.mxu0 %v4844_v50  ;;  %3789 = vmatprep.subr.bf16.mxu1 %v4846_v51  ;;  %v391_v50 = vld [vmem:[#allocation5 + $0x978] sm:$0xff]  ;;  %v4899_v51 = vcombine.low %v378_v40, %v382_v41  ;;  %v4908_v54 = vcombine.high %v386_v47, %v390_v48 }
 0x1d2   :  { %v4910_v56 = vcombine.high %v387_v49, %v391_v50  ;;  %v4909_v63 = vcombine.low %v387_v49, %v391_v50  ;;  %v450_v50 = vld [vmem:[#allocation5 + $0xb50] sm:$0xff] }
 0x1d4   :  { %3626 = vmatpush1.bf16.msra.mxu0 %v4843_v59  ;;  %3790 = vmatpush1.bf16.msra.mxu1 %v4845_v60  ;;  %v398_v59 = vld [vmem:[#allocation5 + $0x9b0] sm:$0xff]  ;;  %v395_v60 = vld [vmem:[#allocation5 + $0x998] sm:$0xff] }
 0x1d5   :  { %3627 = vmatprep.subr.bf16.mxu0 %v4852_v61  ;;  %3791 = vmatprep.subr.bf16.mxu1 %v4854_v62  ;;  %v399_v61 = vld [vmem:[#allocation5 + $0x9b8] sm:$0xff]  ;;  %v4907_v62 = vcombine.low %v386_v47, %v390_v48  ;;  %v4916_v0 = vcombine.high %v394_v58, %v398_v59 }
 0x1d6   :  { %v4918_v1 = vcombine.high %v395_v60, %v399_v61  ;;  %v4917_v6 = vcombine.low %v395_v60, %v399_v61  ;;  %v458_v61 = vld [vmem:[#allocation5 + $0xb90] sm:$0xff] }
 0x1d8   :  { %3628 = vmatpush1.bf16.msra.mxu0 %v4851_v39  ;;  %3792 = vmatpush1.bf16.msra.mxu1 %v4853_v3  ;;  %v406_v39 = vld [vmem:[#allocation5 + $0x9f0] sm:$0xff]  ;;  %v403_v3 = vld [vmem:[#allocation5 + $0x9d8] sm:$0xff] }
 0x1d9   :  { %3629 = vmatprep.subr.bf16.mxu0 %v4860_v4  ;;  %3793 = vmatprep.subr.bf16.mxu1 %v4862_v5  ;;  %v407_v4 = vld [vmem:[#allocation5 + $0x9f8] sm:$0xff]  ;;  %v4915_v5 = vcombine.low %v394_v58, %v398_v59  ;;  %v4924_v7 = vcombine.high %v402_v2, %v406_v39 }
 0x1da   :  { %v4926_v8 = vcombine.high %v403_v3, %v407_v4  ;;  %v4925_v16 = vcombine.low %v403_v3, %v407_v4  ;;  %v466_v4 = vld [vmem:[#allocation5 + $0xbd0] sm:$0xff] }
 0x1dc   :  { %3630 = vmatpush1.bf16.msra.mxu0 %v4859_v10  ;;  %3794 = vmatpush1.bf16.msra.mxu1 %v4861_v11  ;;  %v414_v10 = vld [vmem:[#allocation5 + $0xa30] sm:$0xff]  ;;  %v411_v11 = vld [vmem:[#allocation5 + $0xa18] sm:$0xff] }
 0x1dd   :  { %3640 = vmatprep.subr.bf16.mxu0 %v4868_v13  ;;  %3804 = vmatprep.subr.bf16.mxu1 %v4870_v14  ;;  %v415_v13 = vld [vmem:[#allocation5 + $0xa38] sm:$0xff]  ;;  %v4923_v14 = vcombine.low %v402_v2, %v406_v39  ;;  %v4932_v17 = vcombine.high %v410_v9, %v414_v10 }
 0x1de   :  { %v4934_v18 = vcombine.high %v411_v11, %v415_v13  ;;  %v4933_v23 = vcombine.low %v411_v11, %v415_v13  ;;  %v474_v13 = vld [vmem:[#allocation5 + $0xc10] sm:$0xff] }
 0x1df   :  { %3632 = vmatmul.mubr.bf16.vlgmr.msra.gmra.mrb[4].mxu0 %v5676_v25  ;;  %3796 = vmatmul.mubr.bf16.vlgmr.msra.gmra.mrb[4].mxu1 %v5676_v25  ;;  %v4885_v25 = vcombine.low %v363_v27, %v367_v12  ;;  %v426_v12 = vld [vmem:[#allocation5 + $0xa90] sm:$0xff] }
 0x1e0   :  { %3641 = vmatpush1.bf16.msra.mxu0 %v4867_v20  ;;  %3805 = vmatpush1.bf16.msra.mxu1 %v4869_v21  ;;  %v422_v20 = vld [vmem:[#allocation5 + $0xa70] sm:$0xff]  ;;  %v419_v21 = vld [vmem:[#allocation5 + $0xa58] sm:$0xff] }
 0x1e1   :  { %3642 = vmatprep.subr.bf16.mxu0 %v4876_v22  ;;  %3806 = vmatprep.subr.bf16.mxu1 %v4878_v57  ;;  %v423_v22 = vld [vmem:[#allocation5 + $0xa78] sm:$0xff]  ;;  %v4931_v57 = vcombine.low %v410_v9, %v414_v10  ;;  %v4940_v26 = vcombine.high %v418_v19, %v422_v20 }
 0x1e2   :  { %3672 = vmatprep.mubr.bf16.mxu0 %v5680_v32  ;;  %3836 = vmatprep.mubr.bf16.mxu1 %v5680_v32  ;;  %v4902_v32 = vcombine.high %v379_v42, %v383_v43  ;;  %v4942_v27 = vcombine.high %v419_v21, %v423_v22  ;;  %v4941_v33 = vcombine.low %v419_v21, %v423_v22  ;;  %v442_v43 = vld [vmem:[#allocation5 + $0xb10] sm:$0xff] }
 0x1e3   :  { %v482_v22 = vld [vmem:[#allocation5 + $0xc50] sm:$0xff] }
 0x1e4   :  { %3643 = vmatpush1.bf16.msra.mxu0 %v4875_v28  ;;  %3807 = vmatpush1.bf16.msra.mxu1 %v4877_v29  ;;  %v430_v28 = vld [vmem:[#allocation5 + $0xab0] sm:$0xff]  ;;  %v427_v29 = vld [vmem:[#allocation5 + $0xa98] sm:$0xff] }
 0x1e5   :  { %3644 = vmatprep.subr.bf16.mxu0 %v4884_v30  ;;  %3808 = vmatprep.subr.bf16.mxu1 %v4886_v31  ;;  %v431_v30 = vld [vmem:[#allocation5 + $0xab8] sm:$0xff]  ;;  %v4939_v31 = vcombine.low %v418_v19, %v422_v20  ;;  %v4948_v34 = vcombine.high %v426_v12, %v430_v28 }
 0x1e6   :  { %v4950_v15 = vcombine.high %v427_v29, %v431_v30  ;;  %v4949_v40 = vcombine.low %v427_v29, %v431_v30  ;;  %v490_v30 = vld [vmem:[#allocation5 + $0xc90] sm:$0xff] }
 0x1e8   :  { %3645 = vmatpush1.bf16.msra.mxu0 %v4883_v37  ;;  %3809 = vmatpush1.bf16.msra.mxu1 %v4885_v25  ;;  %v438_v37 = vld [vmem:[#allocation5 + $0xaf0] sm:$0xff]  ;;  %v435_v25 = vld [vmem:[#allocation5 + $0xad8] sm:$0xff] }
 0x1e9   :  { %3646 = vmatprep.subr.bf16.mxu0 %v4892_v53  ;;  %3810 = vmatprep.subr.bf16.mxu1 %v4894_v38  ;;  %v439_v53 = vld [vmem:[#allocation5 + $0xaf8] sm:$0xff]  ;;  %v4947_v38 = vcombine.low %v426_v12, %v430_v28  ;;  %v4956_v41 = vcombine.high %v434_v35, %v438_v37 }
 0x1ea   :  { %v4958_v42 = vcombine.high %v435_v25, %v439_v53  ;;  %v4957_v47 = vcombine.low %v435_v25, %v439_v53  ;;  %v498_v53 = vld [vmem:[#allocation5 + $0xcd0] sm:$0xff] }
 0x1ec   :  { %3647 = vmatpush1.bf16.msra.mxu0 %v4891_v44  ;;  %3811 = vmatpush1.bf16.msra.mxu1 %v4893_v45  ;;  %v446_v44 = vld [vmem:[#allocation5 + $0xb30] sm:$0xff]  ;;  %v443_v45 = vld [vmem:[#allocation5 + $0xb18] sm:$0xff] }
 0x1ed   :  { %3648 = vmatprep.subr.bf16.mxu0 %v4900_v24  ;;  %3812 = vmatprep.subr.bf16.mxu1 %v4902_v32  ;;  %v447_v24 = vld [vmem:[#allocation5 + $0xb38] sm:$0xff]  ;;  %v4955_v32 = vcombine.low %v434_v35, %v438_v37  ;;  %v4964_v48 = vcombine.high %v442_v43, %v446_v44 }
 0x1ee   :  { %v4966_v49 = vcombine.high %v443_v45, %v447_v24  ;;  %v4965_v58 = vcombine.low %v443_v45, %v447_v24  ;;  %v506_v45 = vld [vmem:[#allocation5 + $0xd10] sm:$0xff] }
 0x1ef   :  { %v510_v24 = vld [vmem:[#allocation5 + $0xd30] sm:$0xff] }
 0x1f0   :  { %3649 = vmatpush1.bf16.msra.mxu0 %v4899_v51  ;;  %3813 = vmatpush1.bf16.msra.mxu1 %v4901_v52  ;;  %v454_v51 = vld [vmem:[#allocation5 + $0xb70] sm:$0xff]  ;;  %v451_v52 = vld [vmem:[#allocation5 + $0xb58] sm:$0xff] }
 0x1f1   :  { %3650 = vmatprep.subr.bf16.mxu0 %v4908_v54  ;;  %3814 = vmatprep.subr.bf16.mxu1 %v4910_v56  ;;  %v455_v54 = vld [vmem:[#allocation5 + $0xb78] sm:$0xff]  ;;  %v4963_v56 = vcombine.low %v442_v43, %v446_v44  ;;  %v4972_v59 = vcombine.high %v450_v50, %v454_v51 }
 0x1f2   :  { %v4974_v60 = vcombine.high %v451_v52, %v455_v54  ;;  %v4973_v2 = vcombine.low %v451_v52, %v455_v54  ;;  %v518_v52 = vld [vmem:[#allocation5 + $0xd70] sm:$0xff]  ;;  %v515_v54 = vld [vmem:[#allocation5 + $0xd58] sm:$0xff] }
 0x1f4   :  { %3651 = vmatpush1.bf16.msra.mxu0 %v4907_v62  ;;  %3815 = vmatpush1.bf16.msra.mxu1 %v4909_v63  ;;  %v462_v62 = vld [vmem:[#allocation5 + $0xbb0] sm:$0xff]  ;;  %v459_v63 = vld [vmem:[#allocation5 + $0xb98] sm:$0xff] }
 0x1f5   :  { %3652 = vmatprep.subr.bf16.mxu0 %v4916_v0  ;;  %3816 = vmatprep.subr.bf16.mxu1 %v4918_v1  ;;  %v463_v0 = vld [vmem:[#allocation5 + $0xbb8] sm:$0xff]  ;;  %v4971_v1 = vcombine.low %v450_v50, %v454_v51  ;;  %v4980_v39 = vcombine.high %v458_v61, %v462_v62  ;;  %v5028_v50 = vcombine.high %v506_v45, %v510_v24  ;;  %v514_v51 = vld [vmem:[#allocation5 + $0xd50] sm:$0xff] }
 0x1f6   :  { %v4982_v3 = vcombine.high %v459_v63, %v463_v0  ;;  %v4981_v9 = vcombine.low %v459_v63, %v463_v0  ;;  %v526_v63 = vld [vmem:[#allocation5 + $0xdb0] sm:$0xff]  ;;  %v523_v0 = vld [vmem:[#allocation5 + $0xd98] sm:$0xff] }
 0x1f8   :  { %3653 = vmatpush1.bf16.msra.mxu0 %v4915_v5  ;;  %3817 = vmatpush1.bf16.msra.mxu1 %v4917_v6  ;;  %v470_v5 = vld [vmem:[#allocation5 + $0xbf0] sm:$0xff]  ;;  %v467_v6 = vld [vmem:[#allocation5 + $0xbd8] sm:$0xff] }
 0x1f9   :  { %3654 = vmatprep.subr.bf16.mxu0 %v4924_v7  ;;  %3818 = vmatprep.subr.bf16.mxu1 %v4926_v8  ;;  %v471_v7 = vld [vmem:[#allocation5 + $0xbf8] sm:$0xff]  ;;  %v4979_v8 = vcombine.low %v458_v61, %v462_v62  ;;  %v4988_v10 = vcombine.high %v466_v4, %v470_v5  ;;  %v522_v62 = vld [vmem:[#allocation5 + $0xd90] sm:$0xff] }
 0x1fa   :  { %v4990_v11 = vcombine.high %v467_v6, %v471_v7  ;;  %v4989_v19 = vcombine.low %v467_v6, %v471_v7  ;;  %v530_v6 = vld [vmem:[#allocation5 + $0xdd0] sm:$0xff] }
 0x1fb   :  { %v534_v7 = vld [vmem:[#allocation5 + $0xdf0] sm:$0xff] }
 0x1fc   :  { %3655 = vmatpush1.bf16.msra.mxu0 %v4923_v14  ;;  %3819 = vmatpush1.bf16.msra.mxu1 %v4925_v16  ;;  %v478_v14 = vld [vmem:[#allocation5 + $0xc30] sm:$0xff]  ;;  %v475_v16 = vld [vmem:[#allocation5 + $0xc18] sm:$0xff] }
 0x1fd   :  { %3656 = vmatprep.subr.bf16.mxu0 %v4932_v17  ;;  %3820 = vmatprep.subr.bf16.mxu1 %v4934_v18  ;;  %v479_v17 = vld [vmem:[#allocation5 + $0xc38] sm:$0xff]  ;;  %v4987_v18 = vcombine.low %v466_v4, %v470_v5  ;;  %v4996_v20 = vcombine.high %v474_v13, %v478_v14 }
 0x1fe   :  { %v4998_v21 = vcombine.high %v475_v16, %v479_v17  ;;  %v4997_v12 = vcombine.low %v475_v16, %v479_v17  ;;  %v5043_v16 = vcombine.low %v522_v62, %v526_v63 }
 0x200   :  { %3657 = vmatpush1.bf16.msra.mxu0 %v4931_v57  ;;  %3821 = vmatpush1.bf16.msra.mxu1 %v4933_v23  ;;  %v486_v57 = vld [vmem:[#allocation5 + $0xc70] sm:$0xff]  ;;  %v483_v23 = vld [vmem:[#allocation5 + $0xc58] sm:$0xff] }
 0x201   :  { %3658 = vmatprep.subr.bf16.mxu0 %v4940_v26  ;;  %3822 = vmatprep.subr.bf16.mxu1 %v4942_v27  ;;  %v487_v26 = vld [vmem:[#allocation5 + $0xc78] sm:$0xff]  ;;  %v4995_v27 = vcombine.low %v474_v13, %v478_v14  ;;  %v5004_v28 = vcombine.high %v482_v22, %v486_v57 }
 0x202   :  { %v5006_v29 = vcombine.high %v483_v23, %v487_v26  ;;  %v5005_v35 = vcombine.low %v483_v23, %v487_v26  ;;  %v542_v23 = vld [vmem:[#allocation5 + $0xe30] sm:$0xff]  ;;  %v539_v26 = vld [vmem:[#allocation5 + $0xe18] sm:$0xff] }
 0x204   :  { %3659 = vmatpush1.bf16.msra.mxu0 %v4939_v31  ;;  %3823 = vmatpush1.bf16.msra.mxu1 %v4941_v33  ;;  %v494_v31 = vld [vmem:[#allocation5 + $0xcb0] sm:$0xff]  ;;  %v491_v33 = vld [vmem:[#allocation5 + $0xc98] sm:$0xff] }
 0x205   :  { %3660 = vmatprep.subr.bf16.mxu0 %v4948_v34  ;;  %3824 = vmatprep.subr.bf16.mxu1 %v4950_v15  ;;  %v495_v34 = vld [vmem:[#allocation5 + $0xcb8] sm:$0xff]  ;;  %v5003_v15 = vcombine.low %v482_v22, %v486_v57  ;;  %v5012_v37 = vcombine.high %v490_v30, %v494_v31  ;;  %v538_v57 = vld [vmem:[#allocation5 + $0xe10] sm:$0xff] }
 0x206   :  { %v5014_v25 = vcombine.high %v491_v33, %v495_v34 }
 0x208   :  { %3661 = vmatpush1.bf16.msra.mxu0 %v4947_v38  ;;  %3825 = vmatpush1.bf16.msra.mxu1 %v4949_v40  ;;  %v502_v38 = vld [vmem:[#allocation5 + $0xcf0] sm:$0xff]  ;;  %v499_v40 = vld [vmem:[#allocation5 + $0xcd8] sm:$0xff] }
 0x209   :  { %3662 = vmatprep.subr.bf16.mxu0 %v4956_v41  ;;  %3826 = vmatprep.subr.bf16.mxu1 %v4958_v42  ;;  %v503_v41 = vld [vmem:[#allocation5 + $0xcf8] sm:$0xff]  ;;  %v5011_v42 = vcombine.low %v490_v30, %v494_v31  ;;  %v5020_v43 = vcombine.high %v498_v53, %v502_v38  ;;  %v546_v31 = vld [vmem:[#allocation5 + $0xe50] sm:$0xff] }
 0x20a   :  { %v5022_v44 = vcombine.high %v499_v40, %v503_v41 }
 0x20c   :  { %3663 = vmatpush1.bf16.msra.mxu0 %v4955_v32  ;;  %3827 = vmatpush1.bf16.msra.mxu1 %v4957_v47  ;;  %v507_v32 = vld [vmem:[#allocation5 + $0xd18] sm:$0xff] }
 0x20d   :  { %3664 = vmatprep.subr.bf16.mxu0 %v4964_v48  ;;  %3828 = vmatprep.subr.bf16.mxu1 %v4966_v49  ;;  %v511_v47 = vld [vmem:[#allocation5 + $0xd38] sm:$0xff]  ;;  %v5019_v48 = vcombine.low %v498_v53, %v502_v38  ;;  %v5021_v49 = vcombine.low %v499_v40, %v503_v41  ;;  %v554_v38 = vld [vmem:[#allocation5 + $0xe90] sm:$0xff] }
 0x20e   :  { %v558_v40 = vld [vmem:[#allocation5 + $0xeb0] sm:$0xff]  ;;  %v555_v41 = vld [vmem:[#allocation5 + $0xe98] sm:$0xff] }
 0x210   :  { %3665 = vmatpush1.bf16.msra.mxu0 %v4963_v56  ;;  %3829 = vmatpush1.bf16.msra.mxu1 %v4965_v58  ;;  %v519_v56 = vld [vmem:[#allocation5 + $0xd78] sm:$0xff]  ;;  %v5027_v58 = vcombine.low %v506_v45, %v510_v24  ;;  %v562_v24 = vld [vmem:[#allocation5 + $0xed0] sm:$0xff] }
 0x211   :  { %3666 = vmatprep.subr.bf16.mxu0 %v4972_v59  ;;  %3830 = vmatprep.subr.bf16.mxu1 %v4974_v60  ;;  %v5029_v59 = vcombine.low %v507_v32, %v511_v47  ;;  %v5036_v60 = vcombine.high %v514_v51, %v518_v52  ;;  %v5038_v61 = vcombine.high %v515_v54, %v519_v56 }
 0x214   :  { %3667 = vmatpush1.bf16.msra.mxu0 %v4971_v1  ;;  %3831 = vmatpush1.bf16.msra.mxu1 %v4973_v2  ;;  %v527_v1 = vld [vmem:[#allocation5 + $0xdb8] sm:$0xff]  ;;  %v5035_v2 = vcombine.low %v514_v51, %v518_v52  ;;  %v570_v52 = vld [vmem:[#allocation5 + $0xf10] sm:$0xff] }
 0x215   :  { %3668 = vmatprep.subr.bf16.mxu0 %v4980_v39  ;;  %3832 = vmatprep.subr.bf16.mxu1 %v4982_v3  ;;  %v5037_v39 = vcombine.low %v515_v54, %v519_v56  ;;  %v5044_v3 = vcombine.high %v522_v62, %v526_v63  ;;  %v5046_v5 = vcombine.high %v523_v0, %v527_v1  ;;  %v574_v54 = vld [vmem:[#allocation5 + $0xf30] sm:$0xff]  ;;  %v602_v56 = vlaneseq }
 0x216   :  { %v5092_v62 = vcombine.high %v570_v52, %v574_v54 }
 0x218   :  { %3669 = vmatpush1.bf16.msra.mxu0 %v4979_v8  ;;  %3833 = vmatpush1.bf16.msra.mxu1 %v4981_v9 }
 0x219   :  { %3670 = vmatprep.subr.bf16.mxu0 %v4988_v10  ;;  %3834 = vmatprep.subr.bf16.mxu1 %v4990_v11  ;;  %v531_v10 = vld [vmem:[#allocation5 + $0xdd8] sm:$0xff] }
 0x21a   :  { %v535_v11 = vld [vmem:[#allocation5 + $0xdf8] sm:$0xff] }
 0x21b   :  { %v5054_v22 = vcombine.high %v531_v10, %v535_v11 }
 0x21c   :  { %3671 = vmatpush1.bf16.msra.mxu0 %v4987_v18  ;;  %3835 = vmatpush1.bf16.msra.mxu1 %v4989_v19  ;;  %v5045_v19 = vcombine.low %v523_v0, %v527_v1  ;;  %v578_v0 = vld [vmem:[#allocation5 + $0xf50] sm:$0xff] }
 0x21d   :  { %3681 = vmatprep.subr.bf16.mxu0 %v4996_v20  ;;  %3845 = vmatprep.subr.bf16.mxu1 %v4998_v21  ;;  %v5052_v20 = vcombine.high %v530_v6, %v534_v7  ;;  %v582_v1 = vld [vmem:[#allocation5 + $0xf70] sm:$0xff] }
 0x21f   :  { %3673 = vmatmul.mubr.bf16.vlgmr.msra.gmra.mrb[4].mxu0 %v5688_v36  ;;  %3837 = vmatmul.mubr.bf16.vlgmr.msra.gmra.mrb[4].mxu1 %v5688_v36  ;;  %v5013_v36 = vcombine.low %v491_v33, %v495_v34  ;;  %v550_v33 = vld [vmem:[#allocation5 + $0xe70] sm:$0xff]  ;;  %v547_v34 = vld [vmem:[#allocation5 + $0xe58] sm:$0xff] }
 0x220   :  { %3682 = vmatpush1.bf16.msra.mxu0 %v4995_v27  ;;  %3846 = vmatpush1.bf16.msra.mxu1 %v4997_v12  ;;  %v543_v27 = vld [vmem:[#allocation5 + $0xe38] sm:$0xff]  ;;  %v5051_v12 = vcombine.low %v530_v6, %v534_v7  ;;  %v5100_v7 = vcombine.high %v578_v0, %v582_v1 }
 0x221   :  { %3683 = vmatprep.subr.bf16.mxu0 %v5004_v28  ;;  %3847 = vmatprep.subr.bf16.mxu1 %v5006_v29  ;;  %v5053_v28 = vcombine.low %v531_v10, %v535_v11  ;;  %v5060_v29 = vcombine.high %v538_v57, %v542_v23  ;;  %v5062_v30 = vcombine.high %v539_v26, %v543_v27  ;;  %v586_v11 = vld [vmem:[#allocation5 + $0xf90] sm:$0xff] }
 0x222   :  { %3713 = vmatprep.mubr.bf16.mxu0 %v5694_v46  ;;  %3877 = vmatprep.mubr.bf16.mxu1 %v5694_v46  ;;  %v5030_v46 = vcombine.high %v507_v32, %v511_v47  ;;  %v566_v32 = vld [vmem:[#allocation5 + $0xef0] sm:$0xff]  ;;  %v563_v47 = vld [vmem:[#allocation5 + $0xed8] sm:$0xff] }
 0x224   :  { %3684 = vmatpush1.bf16.msra.mxu0 %v5003_v15  ;;  %3848 = vmatpush1.bf16.msra.mxu1 %v5005_v35  ;;  %v551_v15 = vld [vmem:[#allocation5 + $0xe78] sm:$0xff]  ;;  %v5059_v35 = vcombine.low %v538_v57, %v542_v23 }
 0x225   :  { %3685 = vmatprep.subr.bf16.mxu0 %v5012_v37  ;;  %3849 = vmatprep.subr.bf16.mxu1 %v5014_v25  ;;  %v5061_v37 = vcombine.low %v539_v26, %v543_v27  ;;  %v5068_v25 = vcombine.high %v546_v31, %v550_v33  ;;  %v5070_v53 = vcombine.high %v547_v34, %v551_v15  ;;  %v594_v26 = vld [vmem:[#allocation5 + $0xfd0] sm:$0xff] }
 0x226   :  { %v598_v27 = vld [vmem:[#allocation5 + $0xff0] sm:$0xff] }
 0x228   :  { %3686 = vmatpush1.bf16.msra.mxu0 %v5011_v42  ;;  %3850 = vmatpush1.bf16.msra.mxu1 %v5013_v36  ;;  %v559_v42 = vld [vmem:[#allocation5 + $0xeb8] sm:$0xff]  ;;  %v5067_v36 = vcombine.low %v546_v31, %v550_v33 }
 0x229   :  { %3687 = vmatprep.subr.bf16.mxu0 %v5020_v43  ;;  %3851 = vmatprep.subr.bf16.mxu1 %v5022_v44  ;;  %v5069_v43 = vcombine.low %v547_v34, %v551_v15  ;;  %v5076_v44 = vcombine.high %v554_v38, %v558_v40  ;;  %v5078_v45 = vcombine.high %v555_v41, %v559_v42 }
 0x22a   :  { %v5116_v34 = vcombine.high %v594_v26, %v598_v27 }
 0x22c   :  { %3688 = vmatpush1.bf16.msra.mxu0 %v5019_v48  ;;  %3852 = vmatpush1.bf16.msra.mxu1 %v5021_v49  ;;  %v567_v48 = vld [vmem:[#allocation5 + $0xef8] sm:$0xff]  ;;  %v5075_v49 = vcombine.low %v554_v38, %v558_v40  ;;  %v5346_v38 = vld [vmem:[#allocation8 + $0x40] sm:$0xff]  }
 0x22d   :  { %3689 = vmatprep.subr.bf16.mxu0 %v5028_v50  ;;  %3853 = vmatprep.subr.bf16.mxu1 %v5030_v46  ;;  %v5077_v50 = vcombine.low %v555_v41, %v559_v42  ;;  %v5084_v46 = vcombine.high %v562_v24, %v566_v32  ;;  %v5086_v51 = vcombine.high %v563_v47, %v567_v48  ;;  %v5347_v40 = vld [vmem:[#allocation8 + $0xc0] sm:$0xff]  }
 0x230   :  { %3690 = vmatpush1.bf16.msra.mxu0 %v5027_v58  ;;  %3854 = vmatpush1.bf16.msra.mxu1 %v5029_v59  ;;  %v571_v58 = vld [vmem:[#allocation5 + $0xf18] sm:$0xff] }
 0x231   :  { %3691 = vmatprep.subr.bf16.mxu0 %v5036_v60  ;;  %3855 = vmatprep.subr.bf16.mxu1 %v5038_v61  ;;  %v575_v59 = vld [vmem:[#allocation5 + $0xf38] sm:$0xff]  ;;  %v5083_v60 = vcombine.low %v562_v24, %v566_v32  ;;  %v5085_v61 = vcombine.low %v563_v47, %v567_v48  ;;  %v5352_v24 = vld [vmem:[#allocation8 + $0x8] sm:$0xff]  }
 0x232   :  { %v5720_v4 = vpop.f32.mrb[0].mxu0  ;;  %v5722_v8 = vpop.f32.mrb[0].mxu1  ;;  %v5094_v63 = vcombine.high %v571_v58, %v575_v59  ;;  %v5093_v6 = vcombine.low %v571_v58, %v575_v59  ;;  %v5353_v32 = vld [vmem:[#allocation8 + $0x88] sm:$0xff]   ;;  %v5354_v47 = vld [vmem:[#allocation8 + $0x50] sm:$0xff]   ;;  %v5364_v58 = vld [vmem:[#allocation8 + $0x20] sm:$0xff]  }
 0x233   :  { %v5724_v9 = vpop.f32.mrb[1].mxu0  ;;  %v5726_v13 = vpop.f32.mrb[1].mxu1  ;;  %v5355_v48 = vld [vmem:[#allocation8 + $0xd0] sm:$0xff]  }
 0x234   :  { %v3391_v14 = vpop.f32.mrb[2].mxu0  ;;  %3692 = vmatpush1.bf16.msra.mxu0 %v5035_v2  ;;  %v3555_v17 = vpop.f32.mrb[2].mxu1  ;;  %3856 = vmatpush1.bf16.msra.mxu1 %v5037_v39  ;;  %v5728_v2 = vshrl.u32 %v602_v56, 7  ;;  %v579_v39 = vld [vmem:[#allocation5 + $0xf58] sm:$0xff]  ;;  %v5363_v56 = vld [vmem:[#allocation8 + $0xe0] sm:$0xff]  }
 0x235   :  { %v3392_v18 = vpop.f32.mrb[3].mxu0  ;;  %3693 = vmatprep.subr.bf16.mxu0 %v5044_v3  ;;  %v3556_v21 = vpop.f32.mrb[3].mxu1  ;;  %3857 = vmatprep.subr.bf16.mxu1 %v5046_v5  ;;  %v583_v3 = vld [vmem:[#allocation5 + $0xf78] sm:$0xff]  ;;  %v5091_v5 = vcombine.low %v570_v52, %v574_v54  ;;  %v590_v14 = vld [vmem:[#allocation5 + $0xfb0] sm:$0xff]  ;;  %v5361_v52 = vld [vmem:[#allocation8 + $0x98] sm:$0xff]  }
 0x236   :  { %v5102_v10 = vcombine.high %v579_v39, %v583_v3  ;;  %v587_v17 = vld [vmem:[#allocation5 + $0xf98] sm:$0xff]  ;;  %v5099_v21 = vcombine.low %v578_v0, %v582_v1  ;;  %v5108_v57 = vcombine.high %v586_v11, %v590_v14  ;;  %v5107_v31 = vcombine.low %v586_v11, %v590_v14  ;;  %v5362_v54 = vld [vmem:[#allocation8 + $0x60] sm:$0xff]   ;;  %v5368_v0 = vld [vmem:[#allocation8 + $0x28] sm:$0xff]  }
 0x237   :  { %v591_v18 = vld [vmem:[#allocation5 + $0xfb8] sm:$0xff]  ;;  %v604_v59 = vsub.s32 0, %v5728_v2  ;;  %v5374_v14 = vld [vmem:[#allocation8 + $0x78] sm:$0xff]  }
 0x238   :  { %3694 = vmatpush1.bf16.msra.mxu0 %v5043_v16  ;;  %3858 = vmatpush1.bf16.msra.mxu1 %v5045_v19  ;;  %v608_v16 = vsub.s32 1, %v5728_v2  ;;  %v5731_v19 = vld [vmem:[#allocation7] sm:$0xff]  ;;  %v5110_v23 = vcombine.high %v587_v17, %v591_v18  ;;  %v5109_v33 = vcombine.low %v587_v17, %v591_v18  ;;  %v5373_v11 = vld [vmem:[#allocation8 + $0xb0] sm:$0xff]  }
 0x239   :  { %3695 = vmatprep.subr.bf16.mxu0 %v5052_v20  ;;  %3859 = vmatprep.subr.bf16.mxu1 %v5054_v22  ;;  %v616_v20 = vsub.s32 3, %v5728_v2  ;;  %v5101_v22 = vcombine.low %v579_v39, %v583_v3  ;;  %v605_v1 = vrot.slane %v5731_v19, %v604_v59  ;;  %v5369_v39 = vld [vmem:[#allocation8 + $0xa8] sm:$0xff]   ;;  %v5370_v3 = vld [vmem:[#allocation8 + $0x70] sm:$0xff]   ;;  %v5375_v17 = vld [vmem:[#allocation8 + $0xf8] sm:$0xff]  }
 0x23a   :  { %v5376_v18 = vld [vmem:[#allocation8 + $0x38] sm:$0xff]  }
 0x23c   :  { %3696 = vmatpush1.bf16.msra.mxu0 %v5051_v12  ;;  %3860 = vmatpush1.bf16.msra.mxu1 %v5053_v28  ;;  %v609_v12 = vrot.slane %v5731_v19, %v608_v16  ;;  %v595_v28 = vld [vmem:[#allocation5 + $0xfd8] sm:$0xff] }
 0x23d   :  { %3697 = vmatprep.subr.bf16.mxu0 %v5060_v29  ;;  %3861 = vmatprep.subr.bf16.mxu1 %v5062_v30  ;;  %v599_v29 = vld [vmem:[#allocation5 + $0xff8] sm:$0xff]  ;;  %v617_v30 = vrot.slane %v5731_v19, %v616_v20 }
 0x23e   :  { %v5118_v15 = vcombine.high %v595_v28, %v599_v29 }
 0x240   :  { %3698 = vmatpush1.bf16.msra.mxu0 %v5059_v35  ;;  %3862 = vmatpush1.bf16.msra.mxu1 %v5061_v37  ;;  %v5273_v35 = vadd.f32 %v5724_v9, %v609_v12  ;;  %v5275_v37 = vadd.f32 %v5726_v13, %v617_v30  ;;  %v5351_v13 = vld [vmem:[#allocation8 + $0xc8] sm:$0xff]  }
 0x241   :  { %3699 = vmatprep.subr.bf16.mxu0 %v5068_v25  ;;  %3863 = vmatprep.subr.bf16.mxu1 %v5070_v53  ;;  %v5115_v25 = vcombine.low %v594_v26, %v598_v27  ;;  %v5117_v53 = vcombine.low %v595_v28, %v599_v29  ;;  %v5381_v27 = vld [vmem:[#allocation8 + $0x180] sm:$0xff]   ;;  %v5382_v12 = vld [vmem:[#allocation8 + $0x148] sm:$0xff]  }
 0x242   :  { %v3887_v41 = vmax.f32 %v5273_v35, 0.0  ;;  %v3889_v42 = vmax.f32 %v5275_v37, 0.0  ;;  %v5383_v28 = vld [vmem:[#allocation8 + $0x1c8] sm:$0xff]   ;;  %v5390_v35 = vld [vmem:[#allocation8 + $0x158] sm:$0xff]  }
 0x243   :  { %v5384_v29 = vld [vmem:[#allocation8 + $0x108] sm:$0xff]   ;;  %v5391_v37 = vld [vmem:[#allocation8 + $0x1d8] sm:$0xff]  }
 0x244   :  { %3700 = vmatpush1.bf16.msra.mxu0 %v5067_v36  ;;  %3864 = vmatpush1.bf16.msra.mxu1 %v5069_v43  ;;  %v5348_v36 = vld [vmem:[#allocation8] sm:$0xff]   ;;  %v3895_v9 = vpack.c.bf16 %v3887_v41, %v3887_v41  ;;  %v5385_v30 = vld [vmem:[#allocation8 + $0x188] sm:$0xff]  }
 0x245   :  { %3701 = vmatprep.subr.bf16.mxu0 %v5076_v44  ;;  %3865 = vmatprep.subr.bf16.mxu1 %v5078_v45  ;;  %v5349_v43 = vld [vmem:[#allocation8 + $0x80] sm:$0xff]   ;;  %v5350_v44 = vld [vmem:[#allocation8 + $0x48] sm:$0xff]   ;;  %v3897_v45 = vpack.c.bf16 %v3889_v42, %v3889_v42 }
 0x246   :  { %v5396_v41 = vld [vmem:[#allocation8 + $0x120] sm:$0xff]  }
 0x247   :  { %v5397_v42 = vld [vmem:[#allocation8 + $0x1a0] sm:$0xff]  }
 0x248   :  { %3702 = vmatpush1.bf16.msra.mxu0 %v5075_v49  ;;  %3866 = vmatpush1.bf16.msra.mxu1 %v5077_v50  ;;  %v5356_v49 = vld [vmem:[#allocation8 + $0x10] sm:$0xff]  }
 0x249   :  { %3703 = vmatprep.subr.bf16.mxu0 %v5084_v46  ;;  %3867 = vmatprep.subr.bf16.mxu1 %v5086_v51  ;;  %v5357_v50 = vld [vmem:[#allocation8 + $0x90] sm:$0xff]   ;;  %v5358_v46 = vld [vmem:[#allocation8 + $0x58] sm:$0xff]  }
 0x24a   :  { %v5359_v51 = vld [vmem:[#allocation8 + $0xd8] sm:$0xff]  }
 0x24c   :  { %3704 = vmatpush1.bf16.msra.mxu0 %v5083_v60  ;;  %3868 = vmatpush1.bf16.msra.mxu1 %v5085_v61  ;;  %v5365_v60 = vld [vmem:[#allocation8 + $0xa0] sm:$0xff]   ;;  %v5366_v61 = vld [vmem:[#allocation8 + $0x68] sm:$0xff]  }
 0x24d   :  { %3705 = vmatprep.subr.bf16.mxu0 %v5092_v62  ;;  %3869 = vmatprep.subr.bf16.mxu1 %v5094_v63  ;;  %v612_v62 = vsub.s32 2, %v5728_v2  ;;  %v5367_v63 = vld [vmem:[#allocation8 + $0xe8] sm:$0xff]  }
 0x250   :  { %3706 = vmatpush1.bf16.msra.mxu0 %v5091_v5  ;;  %3870 = vmatpush1.bf16.msra.mxu1 %v5093_v6  ;;  %v613_v5 = vrot.slane %v5731_v19, %v612_v62  ;;  %v5371_v6 = vld [vmem:[#allocation8 + $0xf0] sm:$0xff]  }
 0x251   :  { %3707 = vmatprep.subr.bf16.mxu0 %v5100_v7  ;;  %3871 = vmatprep.subr.bf16.mxu1 %v5102_v10  ;;  %v5372_v7 = vld [vmem:[#allocation8 + $0x30] sm:$0xff]   ;;  %v5272_v10 = vadd.f32 %v5720_v4, %v605_v1  ;;  %v5380_v4 = vld [vmem:[#allocation8 + $0x100] sm:$0xff]  }
 0x252   :  { %v5274_v16 = vadd.f32 %v5722_v8, %v613_v5 }
 0x253   :  { %v3886_v20 = vmax.f32 %v5272_v10, 0.0 }
 0x254   :  { %3708 = vmatpush1.bf16.msra.mxu0 %v5099_v21  ;;  %3872 = vmatpush1.bf16.msra.mxu1 %v5101_v22  ;;  %v5377_v21 = vld [vmem:[#allocation8 + $0xb8] sm:$0xff]   ;;  %v5378_v22 = vld [vmem:[#allocation8 + $0x140] sm:$0xff]  }
 0x255   :  { %3709 = vmatprep.subr.bf16.mxu0 %v5108_v57  ;;  %3873 = vmatprep.subr.bf16.mxu1 %v5110_v23  ;;  %v3888_v57 = vmax.f32 %v5274_v16, 0.0  ;;  %v5379_v23 = vld [vmem:[#allocation8 + $0x1c0] sm:$0xff]   ;;  %v3894_v26 = vpack.c.bf16 %v3886_v20, %v3886_v20 }
 0x257   :  { %v3896_v8 = vpack.c.bf16 %v3888_v57, %v3888_v57  ;;  %v5119_v57 = vld [vmem:[#allocation10] ss:$0 sm:$0xff] }
 0x258   :  { %3710 = vmatpush1.bf16.msra.mxu0 %v5107_v31  ;;  %3874 = vmatpush1.bf16.msra.mxu1 %v5109_v33  ;;  %v5386_v31 = vld [vmem:[#allocation8 + $0x150] sm:$0xff]  }
 0x259   :  { %3711 = vmatprep.subr.bf16.mxu0 %v5116_v34  ;;  %3875 = vmatprep.subr.bf16.mxu1 %v5118_v15  ;;  %v5387_v33 = vld [vmem:[#allocation8 + $0x1d0] sm:$0xff]  }
 0x25a   :  { %v5388_v34 = vld [vmem:[#allocation8 + $0x110] sm:$0xff]  }
 0x25b   :  { %v5389_v15 = vld [vmem:[#allocation8 + $0x190] sm:$0xff]  }
 0x25c   :  { %3712 = vmatpush1.bf16.msra.mxu0 %v5115_v25  ;;  %3876 = vmatpush1.bf16.msra.mxu1 %v5117_v53  ;;  %v5392_v25 = vld [vmem:[#allocation8 + $0x118] sm:$0xff]  }
 0x25d   :  { %5184 = vmatprep.subr.bf16.mxu0 %v5346_v38  ;;  %5206 = vmatprep.subr.bf16.mxu1 %v5347_v40  ;;  %v5393_v53 = vld [vmem:[#allocation8 + $0x198] sm:$0xff]   ;;  %v5394_v38 = vld [vmem:[#allocation8 + $0x160] sm:$0xff]  }
 0x25e   :  { %v5395_v40 = vld [vmem:[#allocation8 + $0x1e0] sm:$0xff]  }
 0x25f   :  { %3714 = vmatmul.mubr.bf16.vlgmr.msra.gmra.mrb[4].mxu0 %v5702_v55  ;;  %3878 = vmatmul.mubr.bf16.vlgmr.msra.gmra.mrb[4].mxu1 %v5702_v55  ;;  %v5360_v55 = vld [vmem:[#allocation8 + $0x18] sm:$0xff]  }
 0x260   :  { %5185 = vmatpush3.bf16.msra.mxu0 %v5348_v36  ;;  %4453 = vmatprep.mubr.bf16.mxu0 %v3895_v9  ;;  %v5398_v36 = vld [vmem:[#allocation8 + $0x168] sm:$0xff]  }
 0x261   :  { %5207 = vmatpush3.bf16.msra.mxu1 %v5349_v43  ;;  %4493 = vmatprep.mubr.bf16.mxu1 %v3897_v45  ;;  %v5399_v43 = vld [vmem:[#allocation8 + $0x1e8] sm:$0xff]   ;;  %v5403_v45 = vld [vmem:[#allocation8 + $0x1f0] sm:$0xff]  }
 0x262   :  { %5186 = vmatprep.subr.bf16.mxu0 %v5350_v44  ;;  %5208 = vmatprep.subr.bf16.mxu1 %v5351_v13  ;;  %v5400_v44 = vld [vmem:[#allocation8 + $0x128] sm:$0xff]   ;;  %v5402_v13 = vld [vmem:[#allocation8 + $0x170] sm:$0xff]  }
 0x263   :  { %v5401_v9 = vld [vmem:[#allocation8 + $0x1a8] sm:$0xff]  }
 0x264   :  { %5187 = vmatpush3.bf16.msra.mxu0 %v5352_v24  ;;  %v5404_v24 = vld [vmem:[#allocation8 + $0x130] sm:$0xff]  }
 0x265   :  { %5209 = vmatpush3.bf16.msra.mxu1 %v5353_v32  ;;  %5188 = vmatprep.subr.bf16.mxu0 %v5354_v47  ;;  %v5405_v32 = vld [vmem:[#allocation8 + $0x1b0] sm:$0xff]   ;;  %v5406_v47 = vld [vmem:[#allocation8 + $0x178] sm:$0xff]  }
 0x266   :  { %5210 = vmatprep.subr.bf16.mxu1 %v5355_v48  ;;  %v5407_v48 = vld [vmem:[#allocation8 + $0x1f8] sm:$0xff]  }
 0x268   :  { %5189 = vmatpush3.bf16.msra.mxu0 %v5356_v49  ;;  %v5408_v49 = vld [vmem:[#allocation8 + $0x138] sm:$0xff]  }
 0x269   :  { %5211 = vmatpush3.bf16.msra.mxu1 %v5357_v50  ;;  %5190 = vmatprep.subr.bf16.mxu0 %v5358_v46  ;;  %v5409_v50 = vld [vmem:[#allocation8 + $0x1b8] sm:$0xff]   ;;  %v620_v46 = vsub.s32 4, %v5728_v2 }
 0x26a   :  { %5212 = vmatprep.subr.bf16.mxu1 %v5359_v51  ;;  %v628_v51 = vsub.s32 6, %v5728_v2 }
 0x26c   :  { %5191 = vmatpush3.bf16.msra.mxu0 %v5360_v55  ;;  %v624_v55 = vsub.s32 5, %v5728_v2 }
 0x26d   :  { %5213 = vmatpush3.bf16.msra.mxu1 %v5361_v52  ;;  %5192 = vmatprep.subr.bf16.mxu0 %v5362_v54  ;;  %v632_v52 = vsub.s32 7, %v5728_v2  ;;  %v621_v54 = vrot.slane %v5731_v19, %v620_v46 }
 0x26e   :  { %5214 = vmatprep.subr.bf16.mxu1 %v5363_v56  ;;  %v629_v56 = vrot.slane %v5731_v19, %v628_v51 }
 0x26f   :  { %v633_v59 = vrot.slane %v5731_v19, %v632_v52 }
 0x270   :  { %5193 = vmatpush3.bf16.msra.mxu0 %v5364_v58  ;;  %v625_v58 = vrot.slane %v5731_v19, %v624_v55 }
 0x271   :  { %5215 = vmatpush3.bf16.msra.mxu1 %v5365_v60  ;;  %5194 = vmatprep.subr.bf16.mxu0 %v5366_v61 }
 0x272   :  { %5216 = vmatprep.subr.bf16.mxu1 %v5367_v63 }
 0x274   :  { %5195 = vmatpush3.bf16.msra.mxu0 %v5368_v0 }
 0x275   :  { %5217 = vmatpush3.bf16.msra.mxu1 %v5369_v39  ;;  %5196 = vmatprep.subr.bf16.mxu0 %v5370_v3 }
 0x276   :  { %5218 = vmatprep.subr.bf16.mxu1 %v5371_v6 }
 0x278   :  { %5197 = vmatpush3.bf16.msra.mxu0 %v5372_v7 }
 0x279   :  { %5219 = vmatpush3.bf16.msra.mxu1 %v5373_v11  ;;  %5198 = vmatprep.subr.bf16.mxu0 %v5374_v14 }
 0x27a   :  { %5220 = vmatprep.subr.bf16.mxu1 %v5375_v17 }
 0x27c   :  { %5199 = vmatpush3.bf16.msra.mxu0 %v5376_v18 }
 0x27d   :  { %5221 = vmatpush3.bf16.msra.mxu1 %v5377_v21  ;;  %5228 = vmatprep.subr.bf16.mxu0 %v5378_v22 }
 0x27e   :  { %5250 = vmatprep.subr.bf16.mxu1 %v5379_v23 }
 0x27f   :  { %4454 = vmatmul.mubr.bf16.vlgmr.msra.gmra.mrb[8].mxu0 %v3894_v26 }
 0x280   :  { %4494 = vmatmul.mubr.bf16.vlgmr.msra.gmra.mrb[8].mxu1 %v3896_v8  ;;  %5229 = vmatpush3.bf16.msra.mxu0 %v5380_v4 }
 0x281   :  { %5251 = vmatpush3.bf16.msra.mxu1 %v5381_v27  ;;  %5230 = vmatprep.subr.bf16.mxu0 %v5382_v12 }
 0x282   :  { %5252 = vmatprep.subr.bf16.mxu1 %v5383_v28 }
 0x284   :  { %5231 = vmatpush3.bf16.msra.mxu0 %v5384_v29 }
 0x285   :  { %5253 = vmatpush3.bf16.msra.mxu1 %v5385_v30  ;;  %5232 = vmatprep.subr.bf16.mxu0 %v5386_v31 }
 0x286   :  { %5254 = vmatprep.subr.bf16.mxu1 %v5387_v33 }
 0x288   :  { %5233 = vmatpush3.bf16.msra.mxu0 %v5388_v34 }
 0x289   :  { %5255 = vmatpush3.bf16.msra.mxu1 %v5389_v15  ;;  %5234 = vmatprep.subr.bf16.mxu0 %v5390_v35 }
 0x28a   :  { %5256 = vmatprep.subr.bf16.mxu1 %v5391_v37 }
 0x28c   :  { %5235 = vmatpush3.bf16.msra.mxu0 %v5392_v25 }
 0x28d   :  { %5257 = vmatpush3.bf16.msra.mxu1 %v5393_v53  ;;  %5236 = vmatprep.subr.bf16.mxu0 %v5394_v38 }
 0x28e   :  { %5258 = vmatprep.subr.bf16.mxu1 %v5395_v40 }
 0x290   :  { %5237 = vmatpush3.bf16.msra.mxu0 %v5396_v41 }
 0x291   :  { %5259 = vmatpush3.bf16.msra.mxu1 %v5397_v42  ;;  %5238 = vmatprep.subr.bf16.mxu0 %v5398_v36 }
 0x292   :  { %5260 = vmatprep.subr.bf16.mxu1 %v5399_v43 }
 0x294   :  { %5239 = vmatpush3.bf16.msra.mxu0 %v5400_v44 }
 0x295   :  { %5261 = vmatpush3.bf16.msra.mxu1 %v5401_v9  ;;  %5240 = vmatprep.subr.bf16.mxu0 %v5402_v13 }
 0x296   :  { %5262 = vmatprep.subr.bf16.mxu1 %v5403_v45 }
 0x298   :  { %5241 = vmatpush3.bf16.msra.mxu0 %v5404_v24 }
 0x299   :  { %5263 = vmatpush3.bf16.msra.mxu1 %v5405_v32  ;;  %5242 = vmatprep.subr.bf16.mxu0 %v5406_v47 }
 0x29a   :  { %5264 = vmatprep.subr.bf16.mxu1 %v5407_v48 }
 0x29c   :  { %5243 = vmatpush3.bf16.msra.mxu0 %v5408_v49 }
 0x29d   :  { %5265 = vmatpush3.bf16.msra.mxu1 %v5409_v50 }
 0x332   :  { %v3715_v60 = vpop.f32.mrb[4].mxu0  ;;  %v3879_v62 = vpop.f32.mrb[4].mxu1 }
 0x333   :  { %v5276_v61 = vadd.f32 %v3715_v60, %v621_v54  ;;  %v3717_v63 = vpop.f32.mrb[5].mxu0  ;;  %v5278_v0 = vadd.f32 %v3879_v62, %v629_v56  ;;  %v3881_v39 = vpop.f32.mrb[5].mxu1 }
 0x334   :  { %v5277_v1 = vadd.f32 %v3717_v63, %v625_v58  ;;  %v3719_v3 = vpop.f32.mrb[6].mxu0  ;;  %v5279_v6 = vadd.f32 %v3881_v39, %v633_v59  ;;  %v3883_v7 = vpop.f32.mrb[6].mxu1 }
 0x335   :  { %v3890_v5 = vmax.f32 %v5276_v61, 0.0  ;;  %v3720_v2 = vpop.f32.mrb[7].mxu0  ;;  %v3892_v10 = vmax.f32 %v5278_v0, 0.0  ;;  %v3884_v14 = vpop.f32.mrb[7].mxu1 }
 0x336   :  { %v3891_v11 = vmax.f32 %v5277_v1, 0.0  ;;  %v3893_v16 = vmax.f32 %v5279_v6, 0.0 }
 0x337   :  { %v3898_v18 = vpack.c.bf16 %v3890_v5, %v3890_v5  ;;  %v3900_v19 = vpack.c.bf16 %v3892_v10, %v3892_v10 }
 0x338   :  { %v3899_v17 = vpack.c.bf16 %v3891_v11, %v3891_v11  ;;  %v3901_v20 = vpack.c.bf16 %v3893_v16, %v3893_v16 }
 0x33a   :  { %4533 = vmatprep.mubr.bf16.mxu0 %v3899_v17  ;;  %4573 = vmatprep.mubr.bf16.mxu1 %v3901_v20 }
 0x33b   :  { %4534 = vmatmul.mubr.bf16.vlgmr.msra.gmra.mrb[12].mxu0 %v3898_v18  ;;  %4574 = vmatmul.mubr.bf16.vlgmr.msra.gmra.mrb[12].mxu1 %v3900_v19 }
 0x352   :  { %v5200_v21 = vpop.f32.mrb[8].mxu0 }
 0x353   :  { %v5222_v22 = vpop.f32.mrb[8].mxu1  ;;  %v5201_v23 = vpop.f32.mrb[9].mxu0 }
 0x354   :  { %v5202_v4 = vadd.f32 %v5201_v23, %v5200_v21  ;;  %v5223_v26 = vpop.f32.mrb[9].mxu1  ;;  %v5203_v27 = vpop.f32.mrb[10].mxu0 }
 0x355   :  { %v5224_v12 = vadd.f32 %v5223_v26, %v5222_v22  ;;  %v5225_v8 = vpop.f32.mrb[10].mxu1  ;;  %v5204_v28 = vpop.f32.mrb[11].mxu0 }
 0x356   :  { %v4456_v29 = vadd.f32 %v5202_v4, %v5119_v57  ;;  %v5226_v30 = vpop.f32.mrb[11].mxu1 }
 0x358   :  { %v4496_v31 = vadd.f32 %v5224_v12, %v4456_v29 }
 0x40e   :  { %v5244_v33 = vpop.f32.mrb[12].mxu0  ;;  %v5266_v34 = vpop.f32.mrb[12].mxu1 }
 0x40f   :  { %v5245_v15 = vpop.f32.mrb[13].mxu0  ;;  %v5267_v37 = vpop.f32.mrb[13].mxu1 }
 0x410   :  { %v5246_v35 = vadd.f32 %v5245_v15, %v5244_v33  ;;  %v5247_v25 = vpop.f32.mrb[14].mxu0  ;;  %v5268_v53 = vadd.f32 %v5267_v37, %v5266_v34  ;;  %v5269_v38 = vpop.f32.mrb[14].mxu1 }
 0x411   :  { %v5248_v40 = vpop.f32.mrb[15].mxu0  ;;  %v5270_v42 = vpop.f32.mrb[15].mxu1 }
 0x412   :  { %v4536_v41 = vadd.f32 %v5246_v35, %v4496_v31 }
 0x414   :  { %v4576_v36 = vadd.f32 %v5268_v53, %v4536_v41 }
 0x416   :  { %4581 = vst [vmem:[#allocation11] sm:$0xff] %v4576_v36 }
 0x417   :  { %5531 = shalt.err (!%p5528_p2)
}
 0x418   :  { %s5532_s6 = scalar_lea.hbm %s5771_s5, 128 }
 0x419   :  { %p5533_p3 = scmp.ne.s32.totalorder %s5771_s5, %s5532_s6  ;;  %p5536_p4 = scmp.lt.u32.totalorder %s5532_s6, %s5771_s5 }
 0x41b   :  { %p5538_p5 = pnand %p5536_p4, %p5533_p3 }
 0x41d   :  { %5541 = shalt.err (!%p5538_p5)
}
 0x41e   :  { %4591 = dma.vmem_to_hbm [thread:$0]  %s4589_s28, 128, %s5771_s5, [#allocation4]  }
 0x41f   :  { %5548 = dma.done.wait [#allocation4], 128  }
 0x420   :  { %5549 = vsyncadd [#allocation4], 4294967168 }
 0x421   :  { %4595 = vsyncpa [#allocation3], 1 }
 0x422   :  { %4596 = vsyncpa [#allocation6], 1 }
 0x423   :  { %4597 = vsyncpa [#allocation9], 1 }
 0x424   :  { %4598 = vsyncpa [#allocation4], 1 }

</bundles_post_ra>
